<compile_context>
chip_gen: v5e
topology: v5e:2x2
jax: 0.10.0
libtpu: 0.0.40
codegen_flags: <defaults>
</compile_context>

<pallas_src>
import jax
import jax.numpy as jnp
from jax import lax
from jax.experimental import pallas as pl
from jax.experimental.pallas import tpu as pltpu


# ----------------------------- model configuration --------------------------
SEQ_LENGTH   = 16
PATCH_LENGTH = 4
CHANNELS     = 1
NUM_PATCHES  = SEQ_LENGTH // PATCH_LENGTH          # 4
PATCH_DIM    = CHANNELS * PATCH_LENGTH             # 4
DIM          = 32
DEPTH        = 2
HEADS        = 4
DIM_HEAD     = DIM // HEADS                        # 8
MLP_DIM      = 32   # must equal DIM: the reference Classifier is Linear(mlp_dim, C) on dim-wide features
NUM_CLASSES  = 10
N_TOKENS     = NUM_PATCHES + 1                     # cls + patches
SCALE        = float(DIM) ** (-0.5)                # note: full dim, as in the PyTorch code
LN_EPS       = 1e-5


# --------------------------------- kernels -----------------------------------
def _embed_kernel(patches_ref, w_ref, b_ref, cls_ref, pos_ref, o_ref):
    # patches_ref: (1, NP, PD); one sequence per grid step.
    patches = patches_ref[0]                                             # (NP, PD)
    emb = jnp.dot(patches, w_ref[...],
                  preferred_element_type=jnp.float32) + b_ref[...]       # (NP, D)
    tokens = jnp.concatenate([cls_ref[...], emb], axis=0)                # (NP+1, D)
    o_ref[0] = (tokens + pos_ref[...]).astype(o_ref.dtype)


def _layer_kernel(x_ref, g1_ref, be1_ref, wq_ref, wk_ref, wv_ref, wo_ref, bo_ref,
                  g2_ref, be2_ref, w1_ref, b1_ref, w2_ref, b2_ref, o_ref):
    x = x_ref[0]                                                         # (N, D) f32

    # ---- Residual(PreNorm(Attention)) ----
    mu = jnp.mean(x, axis=-1, keepdims=True)
    var = jnp.mean(jnp.square(x - mu), axis=-1, keepdims=True)
    xn = (x - mu) * lax.rsqrt(var + LN_EPS) * g1_ref[...] + be1_ref[...]

    att = jnp.zeros((N_TOKENS, DIM), jnp.float32)
    for h in range(HEADS):                                               # static unroll
        qh = jnp.dot(xn, wq_ref[h], preferred_element_type=jnp.float32)  # (N, DH)
        kh = jnp.dot(xn, wk_ref[h], preferred_element_type=jnp.float32)
        vh = jnp.dot(xn, wv_ref[h], preferred_element_type=jnp.float32)
        # q @ k^T without materializing a transpose.
        dots = lax.dot_general(qh, kh, (((1,), (1,)), ((), ())),
                               preferred_element_type=jnp.float32) * SCALE
        dots = dots - jnp.max(dots, axis=-1, keepdims=True)
        p = jnp.exp(dots)
        attn = p / jnp.sum(p, axis=-1, keepdims=True)
        out_h = jnp.dot(attn, vh, preferred_element_type=jnp.float32)    # (N, DH)
        # concat(out_h) @ Wo  ==  sum_h out_h @ Wo[h]
        att = att + jnp.dot(out_h, wo_ref[h], preferred_element_type=jnp.float32)
    x = x + att + bo_ref[...]

    # ---- Residual(PreNorm(FeedForward)) ----
    mu2 = jnp.mean(x, axis=-1, keepdims=True)
    var2 = jnp.mean(jnp.square(x - mu2), axis=-1, keepdims=True)
    xn2 = (x - mu2) * lax.rsqrt(var2 + LN_EPS) * g2_ref[...] + be2_ref[...]

    h1 = jnp.dot(xn2, w1_ref[...], preferred_element_type=jnp.float32) + b1_ref[...]
    h1 = jax.nn.gelu(h1, approximate=True)   # tanh GELU (tiny deviation from torch erf GELU)
    y = jnp.dot(h1, w2_ref[...], preferred_element_type=jnp.float32) + b2_ref[...]

    o_ref[0] = (x + y).astype(o_ref.dtype)


def _classifier_kernel(feat_ref, wc_ref, bc_ref, o_ref):
    o_ref[...] = (jnp.dot(feat_ref[...], wc_ref[...],
                          preferred_element_type=jnp.float32) + bc_ref[...]).astype(o_ref.dtype)


# ------------------------------ pallas wrappers ------------------------------
def _const_spec(shape):
    nd = len(shape)
    return pl.BlockSpec(shape, lambda i, _nd=nd: (0,) * _nd)


def _embed_call(patches, w_e, b_e, cls_tok, pos):
    B = patches.shape[0]
    return pl.pallas_call(
        _embed_kernel,
        out_shape=jax.ShapeDtypeStruct((B, N_TOKENS, DIM), jnp.float32),
        grid=(B,),
        in_specs=[
            pl.BlockSpec((1, NUM_PATCHES, PATCH_DIM), lambda i: (i, 0, 0)),
            _const_spec((PATCH_DIM, DIM)),
            _const_spec((1, DIM)),
            _const_spec((1, DIM)),
            _const_spec((N_TOKENS, DIM)),
        ],
        out_specs=pl.BlockSpec((1, N_TOKENS, DIM), lambda i: (i, 0, 0)),
        compiler_params=pltpu.CompilerParams(dimension_semantics=("parallel",)),
    )(patches, w_e, b_e, cls_tok, pos)


_LAYER_FLOPS_PER_ITEM = (
    2 * N_TOKENS * DIM * 3 * DIM                     # qkv projections
    + 4 * N_TOKENS * N_TOKENS * DIM                  # q@k^T and attn@v
    + 2 * N_TOKENS * DIM * DIM                       # output projection
    + 4 * N_TOKENS * DIM * MLP_DIM                   # MLP matmuls
)
_LAYER_WEIGHT_BYTES = 4 * (3 * DIM * DIM + DIM * DIM + 2 * DIM * MLP_DIM + 8 * DIM)


def _layer_call(x, layer_params):
    B = x.shape[0]
    in_specs = [pl.BlockSpec((1, N_TOKENS, DIM), lambda i: (i, 0, 0))]
    in_specs += [_const_spec(p.shape) for p in layer_params]
    return pl.pallas_call(
        _layer_kernel,
        out_shape=jax.ShapeDtypeStruct((B, N_TOKENS, DIM), jnp.float32),
        grid=(B,),
        in_specs=in_specs,
        out_specs=pl.BlockSpec((1, N_TOKENS, DIM), lambda i: (i, 0, 0)),
        compiler_params=pltpu.CompilerParams(dimension_semantics=("parallel",)),
        cost_estimate=pl.CostEstimate(
            flops=B * _LAYER_FLOPS_PER_ITEM,
            transcendentals=B * (HEADS * N_TOKENS * N_TOKENS + N_TOKENS * MLP_DIM),
            bytes_accessed=2 * B * N_TOKENS * DIM * 4 + _LAYER_WEIGHT_BYTES,
        ),
    )(x, *layer_params)


def _classifier_call(features, wc, bc):
    B = features.shape[0]
    return pl.pallas_call(
        _classifier_kernel,
        out_shape=jax.ShapeDtypeStruct((B, NUM_CLASSES), jnp.float32),
        in_specs=[
            pl.BlockSpec((B, DIM), lambda: (0, 0)),
            pl.BlockSpec((DIM, NUM_CLASSES), lambda: (0, 0)),
            pl.BlockSpec((1, NUM_CLASSES), lambda: (0, 0)),
        ],
        out_specs=pl.BlockSpec((B, NUM_CLASSES), lambda: (0, 0)),
    )(features, wc, bc)


def set_forward(sequence, params):
    """sequence: (B, seq_length, channels). Returns (predictions, features)."""
    w_e, b_e, cls_tok, pos, layers, wc, bc = params
    b = sequence.shape[0]

    # rearrange 'b (h p1) c -> b h (p1 c)'   (static layout plumbing)
    patches = sequence.reshape(b, NUM_PATCHES, PATCH_LENGTH, CHANNELS)
    patches = patches.reshape(b, NUM_PATCHES, PATCH_DIM)

    x = _embed_call(patches, w_e, b_e, cls_tok, pos)

    for (g1, be1, wqkv, wo, bo, g2, be2, w1, b1, w2, b2) in layers:
        # Pre-split the (static) QKV / output-projection weights per head so the
        # kernel never lane-slices activations.
        wq = wqkv[:, 0 * DIM:1 * DIM].reshape(DIM, HEADS, DIM_HEAD).transpose(1, 0, 2)
        wk = wqkv[:, 1 * DIM:2 * DIM].reshape(DIM, HEADS, DIM_HEAD).transpose(1, 0, 2)
        wv = wqkv[:, 2 * DIM:3 * DIM].reshape(DIM, HEADS, DIM_HEAD).transpose(1, 0, 2)
        wo_h = wo.reshape(HEADS, DIM_HEAD, DIM)
        x = _layer_call(x, (g1, be1, wq, wk, wv, wo_h, bo, g2, be2, w1, b1, w2, b2))

    features = x[:, 0, :]                       # to_cls_token is Identity
    predictions = _classifier_call(features, wc, bc)
    return predictions, features


# ------------------------------- parameters ----------------------------------
def init_params(key):
    k_embed, k_cls, k_pos, k_head, k_layers = jax.random.split(key, 5)

    def linear(k, fan_in, fan_out):
        kw, kb = jax.random.split(k)
        bound = 1.0 / float(fan_in) ** 0.5
        w = jax.random.uniform(kw, (fan_in, fan_out), jnp.float32, -bound, bound)
        b = jax.random.uniform(kb, (1, fan_out), jnp.float32, -bound, bound)
        return w, b

    w_e, b_e = linear(k_embed, PATCH_DIM, DIM)
    cls_tok = jax.random.normal(k_cls, (1, DIM), jnp.float32)
    pos = jax.random.normal(k_pos, (N_TOKENS, DIM), jnp.float32)

    layers = []
    for k in jax.random.split(k_layers, DEPTH):
        k1, k2, k3, k4 = jax.random.split(k, 4)
        bound = 1.0 / float(DIM) ** 0.5
        wqkv = jax.random.uniform(k1, (DIM, 3 * DIM), jnp.float32, -bound, bound)  # bias=False
        wo, bo = linear(k2, DIM, DIM)
        w1, b1 = linear(k3, DIM, MLP_DIM)
        w2, b2 = linear(k4, MLP_DIM, DIM)
        g1 = jnp.ones((1, DIM), jnp.float32); be1 = jnp.zeros((1, DIM), jnp.float32)
        g2 = jnp.ones((1, DIM), jnp.float32); be2 = jnp.zeros((1, DIM), jnp.float32)
        layers.append((g1, be1, wqkv, wo, bo, g2, be2, w1, b1, w2, b2))

    wc, bc = linear(k_head, MLP_DIM, NUM_CLASSES)
    return (w_e, b_e, cls_tok, pos, tuple(layers), wc, bc)


# ---------------------------- pure-JAX reference -----------------------------
def reference_forward(sequence, params):
    w_e, b_e, cls_tok, pos, layers, wc, bc = params
    b = sequence.shape[0]
    patches = sequence.reshape(b, NUM_PATCHES, PATCH_LENGTH, CHANNELS)
    patches = patches.reshape(b, NUM_PATCHES, PATCH_DIM)

    x = patches @ w_e + b_e
    cls = jnp.broadcast_to(cls_tok[None, :, :], (b, 1, DIM))
    x = jnp.concatenate([cls, x], axis=1) + pos[None, :, :]

    def ln(z, g, be):
        mu = jnp.mean(z, axis=-1, keepdims=True)
        var = jnp.mean(jnp.square(z - mu), axis=-1, keepdims=True)
        return (z - mu) * lax.rsqrt(var + LN_EPS) * g + be

    def heads(t):
        return t.reshape(b, N_TOKENS, HEADS, DIM_HEAD).transpose(0, 2, 1, 3)

    for (g1, be1, wqkv, wo, bo, g2, be2, w1, b1, w2, b2) in layers:
        xn = ln(x, g1, be1)
        q, k, v = jnp.split(xn @ wqkv, 3, axis=-1)
        qh, kh, vh = heads(q), heads(k), heads(v)
        dots = jnp.einsum('bhid,bhjd->bhij', qh, kh) * SCALE
        attn = jax.nn.softmax(dots, axis=-1)
        out = jnp.einsum('bhij,bhjd->bhid', attn, vh)
        out = out.transpose(0, 2, 1, 3).reshape(b, N_TOKENS, DIM)
        x = x + (out @ wo + bo)
        xn2 = ln(x, g2, be2)
        x = x + (jax.nn.gelu(xn2 @ w1 + b1, approximate=True) @ w2 + b2)

    features = x[:, 0, :]
    predictions = features @ wc + bc
    return predictions, features


# ----------------------------------- main -------------------------------------
if __name__ == "__main__":
    key = jax.random.PRNGKey(0)
    kx, kp = jax.random.split(key)

    sequence = jax.random.normal(kx, (2, SEQ_LENGTH, CHANNELS), jnp.float32)
    params = init_params(kp)

    forward = jax.jit(set_forward)
    preds, feats = forward(sequence, params)
    preds = jax.block_until_ready(preds)
    feats = jax.block_until_ready(feats)

    ref_preds, ref_feats = reference_forward(sequence, params)
    assert preds.shape == (2, NUM_CLASSES), preds.shape
    assert feats.shape == (2, DIM), feats.shape
    assert jnp.allclose(preds, ref_preds, atol=1e-4, rtol=1e-4), (preds, ref_preds)
    assert jnp.allclose(feats, ref_feats, atol=1e-4, rtol=1e-4), (feats, ref_feats)

    print("KERNEL_OK")
</pallas_src>

<mosaic_0001>
module attributes {stable_mosaic.version = 11 : i64} {
  func.func @_embed_kernel(%arg0: i32, %arg1: memref<1x4x4xf32, #tpu.memory_space<vmem>>, %arg2: memref<4x32xf32, #tpu.memory_space<vmem>>, %arg3: memref<1x32xf32, #tpu.memory_space<vmem>>, %arg4: memref<1x32xf32, #tpu.memory_space<vmem>>, %arg5: memref<5x32xf32, #tpu.memory_space<vmem>>, %arg6: memref<1x5x32xf32, #tpu.memory_space<vmem>>) attributes {dimension_semantics = [#tpu.dimension_semantics<parallel>], iteration_bounds = array<i64: 2>, scalar_prefetch = 0 : i64, scratch_operands = 0 : i64, tpu.core_type = #tpu.core_type<tc>, window_params = [{transform_indices = @transform_0, window_bounds = array<i64: 1, 4, 4>}, {pipeline_mode = #tpu.pipeline_mode<synchronous>, transform_indices = @transform_1, window_bounds = array<i64: 4, 32>}, {pipeline_mode = #tpu.pipeline_mode<synchronous>, transform_indices = @transform_2, window_bounds = array<i64: 1, 32>}, {pipeline_mode = #tpu.pipeline_mode<synchronous>, transform_indices = @transform_3, window_bounds = array<i64: 1, 32>}, {pipeline_mode = #tpu.pipeline_mode<synchronous>, transform_indices = @transform_4, window_bounds = array<i64: 5, 32>}, {transform_indices = @transform_5, window_bounds = array<i64: 1, 5, 32>}]} {
    %c0 = arith.constant 0 : index
    %c0_0 = arith.constant 0 : index
    %c0_1 = arith.constant 0 : index
    %0 = vector.load %arg1[%c0, %c0_0, %c0_1] : memref<1x4x4xf32, #tpu.memory_space<vmem>>, vector<1x4x4xf32>
    %1 = vector.shape_cast %0 : vector<1x4x4xf32> to vector<4x4xf32>
    %c0_2 = arith.constant 0 : index
    %c0_3 = arith.constant 0 : index
    %2 = vector.load %arg2[%c0_2, %c0_3] : memref<4x32xf32, #tpu.memory_space<vmem>>, vector<4x32xf32>
    %cst = arith.constant dense<0.000000e+00> : vector<4x32xf32>
    %3 = tpu.matmul %1, %2, %cst {dimension_numbers = #tpu.dot_dimension_numbers<[1], [0], [0], [1], [0, 0, 1, 1], [], []>} : vector<4x4xf32>, vector<4x32xf32>, vector<4x32xf32> -> vector<4x32xf32>
    %c0_4 = arith.constant 0 : index
    %c0_5 = arith.constant 0 : index
    %4 = vector.load %arg3[%c0_4, %c0_5] : memref<1x32xf32, #tpu.memory_space<vmem>>, vector<1x32xf32>
    %5 = vector.broadcast %4 : vector<1x32xf32> to vector<4x32xf32>
    %6 = arith.addf %3, %5 : vector<4x32xf32>
    %c0_6 = arith.constant 0 : index
    %c0_7 = arith.constant 0 : index
    %7 = vector.load %arg4[%c0_6, %c0_7] : memref<1x32xf32, #tpu.memory_space<vmem>>, vector<1x32xf32>
    %8 = tpu.concatenate %7, %6 in 0 : vector<1x32xf32>, vector<4x32xf32> -> vector<5x32xf32>
    %c0_8 = arith.constant 0 : index
    %c0_9 = arith.constant 0 : index
    %9 = vector.load %arg5[%c0_8, %c0_9] : memref<5x32xf32, #tpu.memory_space<vmem>>, vector<5x32xf32>
    %10 = arith.addf %8, %9 : vector<5x32xf32>
    %c0_10 = arith.constant 0 : index
    %c0_11 = arith.constant 0 : index
    %c0_12 = arith.constant 0 : index
    %11 = vector.load %arg6[%c0_10, %c0_11, %c0_12] : memref<1x5x32xf32, #tpu.memory_space<vmem>>, vector<1x5x32xf32>
    %12 = vector.shape_cast %11 : vector<1x5x32xf32> to vector<5x32xf32>
    %13 = vector.shape_cast %10 : vector<5x32xf32> to vector<1x5x32xf32>
    tpu.vector_store %arg6[%c0_10, %c0_11, %c0_12], %13 {strides = array<i32>} : memref<1x5x32xf32, #tpu.memory_space<vmem>>, vector<1x5x32xf32>,
    return
  }
  func.func @transform_0(%arg0: i32) -> (i32, i32, i32) {
    %c0_i32 = arith.constant 0 : i32
    %c0_i32_0 = arith.constant 0 : i32
    %c0_i32_1 = arith.constant 0 : i32
    return %arg0, %c0_i32, %c0_i32_0 : i32, i32, i32
  }
  func.func @transform_1(%arg0: i32) -> (i32, i32) {
    %c0_i32 = arith.constant 0 : i32
    %c0_i32_0 = arith.constant 0 : i32
    %c0_i32_1 = arith.constant 0 : i32
    return %c0_i32, %c0_i32_0 : i32, i32
  }
  func.func @transform_2(%arg0: i32) -> (i32, i32) {
    %c0_i32 = arith.constant 0 : i32
    %c0_i32_0 = arith.constant 0 : i32
    %c0_i32_1 = arith.constant 0 : i32
    return %c0_i32, %c0_i32_0 : i32, i32
  }
  func.func @transform_3(%arg0: i32) -> (i32, i32) {
    %c0_i32 = arith.constant 0 : i32
    %c0_i32_0 = arith.constant 0 : i32
    %c0_i32_1 = arith.constant 0 : i32
    return %c0_i32, %c0_i32_0 : i32, i32
  }
  func.func @transform_4(%arg0: i32) -> (i32, i32) {
    %c0_i32 = arith.constant 0 : i32
    %c0_i32_0 = arith.constant 0 : i32
    %c0_i32_1 = arith.constant 0 : i32
    return %c0_i32, %c0_i32_0 : i32, i32
  }
  func.func @transform_5(%arg0: i32) -> (i32, i32, i32) {
    %c0_i32 = arith.constant 0 : i32
    %c0_i32_0 = arith.constant 0 : i32
    %c0_i32_1 = arith.constant 0 : i32
    return %arg0, %c0_i32, %c0_i32_0 : i32, i32, i32
  }
}

module attributes {stable_mosaic.version = 11 : i64} {
  func.func @_classifier_kernel(%arg0: memref<2x32xf32, #tpu.memory_space<vmem>>, %arg1: memref<32x10xf32, #tpu.memory_space<vmem>>, %arg2: memref<1x10xf32, #tpu.memory_space<vmem>>, %arg3: memref<2x10xf32, #tpu.memory_space<vmem>>) attributes {dimension_semantics = [], scalar_prefetch = 0 : i64, scratch_operands = 0 : i64, tpu.core_type = #tpu.core_type<tc>} {
    %c0 = arith.constant 0 : index
    %c0_0 = arith.constant 0 : index
    %0 = vector.load %arg0[%c0, %c0_0] : memref<2x32xf32, #tpu.memory_space<vmem>>, vector<2x32xf32>
    %c0_1 = arith.constant 0 : index
    %c0_2 = arith.constant 0 : index
    %1 = vector.load %arg1[%c0_1, %c0_2] : memref<32x10xf32, #tpu.memory_space<vmem>>, vector<32x10xf32>
    %cst = arith.constant dense<0.000000e+00> : vector<2x10xf32>
    %2 = tpu.matmul %0, %1, %cst {dimension_numbers = #tpu.dot_dimension_numbers<[1], [0], [0], [1], [0, 0, 1, 1], [], []>} : vector<2x32xf32>, vector<32x10xf32>, vector<2x10xf32> -> vector<2x10xf32>
    %c0_3 = arith.constant 0 : index
    %c0_4 = arith.constant 0 : index
    %3 = vector.load %arg2[%c0_3, %c0_4] : memref<1x10xf32, #tpu.memory_space<vmem>>, vector<1x10xf32>
    %4 = vector.broadcast %3 : vector<1x10xf32> to vector<2x10xf32>
    %5 = arith.addf %2, %4 : vector<2x10xf32>
    %c0_5 = arith.constant 0 : index
    %c0_6 = arith.constant 0 : index
    %6 = vector.load %arg3[%c0_5, %c0_6] : memref<2x10xf32, #tpu.memory_space<vmem>>, vector<2x10xf32>
    tpu.vector_store %arg3[%c0_5, %c0_6], %5 {strides = array<i32>} : memref<2x10xf32, #tpu.memory_space<vmem>>, vector<2x10xf32>,
    return
  }
}

module attributes {stable_mosaic.version = 11 : i64} {
  func.func @_layer_kernel(%arg0: i32, %arg1: memref<1x5x32xf32, #tpu.memory_space<vmem>>, %arg2: memref<1x32xf32, #tpu.memory_space<vmem>>, %arg3: memref<1x32xf32, #tpu.memory_space<vmem>>, %arg4: memref<4x32x8xf32, #tpu.memory_space<vmem>>, %arg5: memref<4x32x8xf32, #tpu.memory_space<vmem>>, %arg6: memref<4x32x8xf32, #tpu.memory_space<vmem>>, %arg7: memref<4x8x32xf32, #tpu.memory_space<vmem>>, %arg8: memref<1x32xf32, #tpu.memory_space<vmem>>, %arg9: memref<1x32xf32, #tpu.memory_space<vmem>>, %arg10: memref<1x32xf32, #tpu.memory_space<vmem>>, %arg11: memref<32x32xf32, #tpu.memory_space<vmem>>, %arg12: memref<1x32xf32, #tpu.memory_space<vmem>>, %arg13: memref<32x32xf32, #tpu.memory_space<vmem>>, %arg14: memref<1x32xf32, #tpu.memory_space<vmem>>, %arg15: memref<1x5x32xf32, #tpu.memory_space<vmem>>) attributes {dimension_semantics = [#tpu.dimension_semantics<parallel>], iteration_bounds = array<i64: 2>, scalar_prefetch = 0 : i64, scratch_operands = 0 : i64, tpu.core_type = #tpu.core_type<tc>, window_params = [{transform_indices = @transform_0, window_bounds = array<i64: 1, 5, 32>}, {pipeline_mode = #tpu.pipeline_mode<synchronous>, transform_indices = @transform_1, window_bounds = array<i64: 1, 32>}, {pipeline_mode = #tpu.pipeline_mode<synchronous>, transform_indices = @transform_2, window_bounds = array<i64: 1, 32>}, {pipeline_mode = #tpu.pipeline_mode<synchronous>, transform_indices = @transform_3, window_bounds = array<i64: 4, 32, 8>}, {pipeline_mode = #tpu.pipeline_mode<synchronous>, transform_indices = @transform_4, window_bounds = array<i64: 4, 32, 8>}, {pipeline_mode = #tpu.pipeline_mode<synchronous>, transform_indices = @transform_5, window_bounds = array<i64: 4, 32, 8>}, {pipeline_mode = #tpu.pipeline_mode<synchronous>, transform_indices = @transform_6, window_bounds = array<i64: 4, 8, 32>}, {pipeline_mode = #tpu.pipeline_mode<synchronous>, transform_indices = @transform_7, window_bounds = array<i64: 1, 32>}, {pipeline_mode = #tpu.pipeline_mode<synchronous>, transform_indices = @transform_8, window_bounds = array<i64: 1, 32>}, {pipeline_mode = #tpu.pipeline_mode<synchronous>, transform_indices = @transform_9, window_bounds = array<i64: 1, 32>}, {pipeline_mode = #tpu.pipeline_mode<synchronous>, transform_indices = @transform_10, window_bounds = array<i64: 32, 32>}, {pipeline_mode = #tpu.pipeline_mode<synchronous>, transform_indices = @transform_11, window_bounds = array<i64: 1, 32>}, {pipeline_mode = #tpu.pipeline_mode<synchronous>, transform_indices = @transform_12, window_bounds = array<i64: 32, 32>}, {pipeline_mode = #tpu.pipeline_mode<synchronous>, transform_indices = @transform_13, window_bounds = array<i64: 1, 32>}, {transform_indices = @transform_14, window_bounds = array<i64: 1, 5, 32>}]} {
    %c0 = arith.constant 0 : index
    %c0_0 = arith.constant 0 : index
    %c0_1 = arith.constant 0 : index
    %0 = vector.load %arg1[%c0, %c0_0, %c0_1] : memref<1x5x32xf32, #tpu.memory_space<vmem>>, vector<1x5x32xf32>
    %1 = vector.shape_cast %0 : vector<1x5x32xf32> to vector<5x32xf32>
    %cst = arith.constant dense<0.000000e+00> : vector<5xf32>
    %2 = vector.multi_reduction <add>, %1, %cst [1] : vector<5x32xf32> to vector<5xf32>
    %3 = vector.shape_cast %2 : vector<5xf32> to vector<5x1xf32>
    %cst_2 = arith.constant 3.200000e+01 : f32
    %4 = vector.broadcast %cst_2 : f32 to vector<5x1xf32>
    %5 = arith.divf %3, %4 : vector<5x1xf32>
    %6 = vector.broadcast %5 : vector<5x1xf32> to vector<5x32xf32>
    %7 = arith.subf %1, %6 : vector<5x32xf32>
    %8 = arith.mulf %7, %7 : vector<5x32xf32>
    %cst_3 = arith.constant dense<0.000000e+00> : vector<5xf32>
    %9 = vector.multi_reduction <add>, %8, %cst_3 [1] : vector<5x32xf32> to vector<5xf32>
    %10 = vector.shape_cast %9 : vector<5xf32> to vector<5x1xf32>
    %cst_4 = arith.constant 3.200000e+01 : f32
    %11 = vector.broadcast %cst_4 : f32 to vector<5x1xf32>
    %12 = arith.divf %10, %11 : vector<5x1xf32>
    %13 = vector.broadcast %5 : vector<5x1xf32> to vector<5x32xf32>
    %14 = arith.subf %1, %13 : vector<5x32xf32>
    %cst_5 = arith.constant 9.99999974E-6 : f32
    %15 = vector.broadcast %cst_5 : f32 to vector<5x1xf32>
    %16 = arith.addf %12, %15 : vector<5x1xf32>
    %17 = math.rsqrt %16 : vector<5x1xf32>
    %18 = vector.broadcast %17 : vector<5x1xf32> to vector<5x32xf32>
    %19 = arith.mulf %14, %18 : vector<5x32xf32>
    %c0_6 = arith.constant 0 : index
    %c0_7 = arith.constant 0 : index
    %20 = vector.load %arg2[%c0_6, %c0_7] : memref<1x32xf32, #tpu.memory_space<vmem>>, vector<1x32xf32>
    %21 = vector.broadcast %20 : vector<1x32xf32> to vector<5x32xf32>
    %22 = arith.mulf %19, %21 : vector<5x32xf32>
    %c0_8 = arith.constant 0 : index
    %c0_9 = arith.constant 0 : index
    %23 = vector.load %arg3[%c0_8, %c0_9] : memref<1x32xf32, #tpu.memory_space<vmem>>, vector<1x32xf32>
    %24 = vector.broadcast %23 : vector<1x32xf32> to vector<5x32xf32>
    %25 = arith.addf %22, %24 : vector<5x32xf32>
    %cst_10 = arith.constant 0.000000e+00 : f32
    %26 = vector.broadcast %cst_10 : f32 to vector<5x32xf32>
    %c0_11 = arith.constant 0 : index
    %c0_12 = arith.constant 0 : index
    %c0_13 = arith.constant 0 : index
    %27 = vector.load %arg4[%c0_11, %c0_12, %c0_13] : memref<4x32x8xf32, #tpu.memory_space<vmem>>, vector<1x32x8xf32>
    %28 = vector.shape_cast %27 : vector<1x32x8xf32> to vector<32x8xf32>
    %cst_14 = arith.constant dense<0.000000e+00> : vector<5x8xf32>
    %29 = tpu.matmul %25, %28, %cst_14 {dimension_numbers = #tpu.dot_dimension_numbers<[1], [0], [0], [1], [0, 0, 1, 1], [], []>} : vector<5x32xf32>, vector<32x8xf32>, vector<5x8xf32> -> vector<5x8xf32>
    %c0_15 = arith.constant 0 : index
    %c0_16 = arith.constant 0 : index
    %c0_17 = arith.constant 0 : index
    %30 = vector.load %arg5[%c0_15, %c0_16, %c0_17] : memref<4x32x8xf32, #tpu.memory_space<vmem>>, vector<1x32x8xf32>
    %31 = vector.shape_cast %30 : vector<1x32x8xf32> to vector<32x8xf32>
    %cst_18 = arith.constant dense<0.000000e+00> : vector<5x8xf32>
    %32 = tpu.matmul %25, %31, %cst_18 {dimension_numbers = #tpu.dot_dimension_numbers<[1], [0], [0], [1], [0, 0, 1, 1], [], []>} : vector<5x32xf32>, vector<32x8xf32>, vector<5x8xf32> -> vector<5x8xf32>
    %c0_19 = arith.constant 0 : index
    %c0_20 = arith.constant 0 : index
    %c0_21 = arith.constant 0 : index
    %33 = vector.load %arg6[%c0_19, %c0_20, %c0_21] : memref<4x32x8xf32, #tpu.memory_space<vmem>>, vector<1x32x8xf32>
    %34 = vector.shape_cast %33 : vector<1x32x8xf32> to vector<32x8xf32>
    %cst_22 = arith.constant dense<0.000000e+00> : vector<5x8xf32>
    %35 = tpu.matmul %25, %34, %cst_22 {dimension_numbers = #tpu.dot_dimension_numbers<[1], [0], [0], [1], [0, 0, 1, 1], [], []>} : vector<5x32xf32>, vector<32x8xf32>, vector<5x8xf32> -> vector<5x8xf32>
    %cst_23 = arith.constant dense<0.000000e+00> : vector<5x5xf32>
    %36 = tpu.matmul %29, %32, %cst_23 {dimension_numbers = #tpu.dot_dimension_numbers<[1], [1], [0], [0], [0, 0, 1, 0], [], []>} : vector<5x8xf32>, vector<5x8xf32>, vector<5x5xf32> -> vector<5x5xf32>
    %cst_24 = arith.constant 0.176776692 : f32
    %37 = vector.broadcast %cst_24 : f32 to vector<5x5xf32>
    %38 = arith.mulf %36, %37 : vector<5x5xf32>
    %cst_25 = arith.constant dense<0xFF800000> : vector<5xf32>
    %39 = vector.multi_reduction <maximumf>, %38, %cst_25 [1] : vector<5x5xf32> to vector<5xf32>
    %40 = vector.shape_cast %39 : vector<5xf32> to vector<5x1xf32>
    %41 = vector.broadcast %40 : vector<5x1xf32> to vector<5x5xf32>
    %42 = arith.subf %38, %41 : vector<5x5xf32>
    %43 = math.exp %42 : vector<5x5xf32>
    %cst_26 = arith.constant dense<0.000000e+00> : vector<5xf32>
    %44 = vector.multi_reduction <add>, %43, %cst_26 [1] : vector<5x5xf32> to vector<5xf32>
    %45 = vector.shape_cast %44 : vector<5xf32> to vector<5x1xf32>
    %46 = vector.broadcast %45 : vector<5x1xf32> to vector<5x5xf32>
    %47 = arith.divf %43, %46 : vector<5x5xf32>
    %cst_27 = arith.constant dense<0.000000e+00> : vector<5x8xf32>
    %48 = tpu.matmul %47, %35, %cst_27 {dimension_numbers = #tpu.dot_dimension_numbers<[1], [0], [0], [1], [0, 0, 1, 1], [], []>} : vector<5x5xf32>, vector<5x8xf32>, vector<5x8xf32> -> vector<5x8xf32>
    %c0_28 = arith.constant 0 : index
    %c0_29 = arith.constant 0 : index
    %c0_30 = arith.constant 0 : index
    %49 = vector.load %arg7[%c0_28, %c0_29, %c0_30] : memref<4x8x32xf32, #tpu.memory_space<vmem>>, vector<1x8x32xf32>
    %50 = vector.shape_cast %49 : vector<1x8x32xf32> to vector<8x32xf32>
    %cst_31 = arith.constant dense<0.000000e+00> : vector<5x32xf32>
    %51 = tpu.matmul %48, %50, %cst_31 {dimension_numbers = #tpu.dot_dimension_numbers<[1], [0], [0], [1], [0, 0, 1, 1], [], []>} : vector<5x8xf32>, vector<8x32xf32>, vector<5x32xf32> -> vector<5x32xf32>
    %52 = arith.addf %26, %51 : vector<5x32xf32>
    %c1 = arith.constant 1 : index
    %c0_32 = arith.constant 0 : index
    %c0_33 = arith.constant 0 : index
    %53 = vector.load %arg4[%c1, %c0_32, %c0_33] : memref<4x32x8xf32, #tpu.memory_space<vmem>>, vector<1x32x8xf32>
    %54 = vector.shape_cast %53 : vector<1x32x8xf32> to vector<32x8xf32>
    %cst_34 = arith.constant dense<0.000000e+00> : vector<5x8xf32>
    %55 = tpu.matmul %25, %54, %cst_34 {dimension_numbers = #tpu.dot_dimension_numbers<[1], [0], [0], [1], [0, 0, 1, 1], [], []>} : vector<5x32xf32>, vector<32x8xf32>, vector<5x8xf32> -> vector<5x8xf32>
    %c1_35 = arith.constant 1 : index
    %c0_36 = arith.constant 0 : index
    %c0_37 = arith.constant 0 : index
    %56 = vector.load %arg5[%c1_35, %c0_36, %c0_37] : memref<4x32x8xf32, #tpu.memory_space<vmem>>, vector<1x32x8xf32>
    %57 = vector.shape_cast %56 : vector<1x32x8xf32> to vector<32x8xf32>
    %cst_38 = arith.constant dense<0.000000e+00> : vector<5x8xf32>
    %58 = tpu.matmul %25, %57, %cst_38 {dimension_numbers = #tpu.dot_dimension_numbers<[1], [0], [0], [1], [0, 0, 1, 1], [], []>} : vector<5x32xf32>, vector<32x8xf32>, vector<5x8xf32> -> vector<5x8xf32>
    %c1_39 = arith.constant 1 : index
    %c0_40 = arith.constant 0 : index
    %c0_41 = arith.constant 0 : index
    %59 = vector.load %arg6[%c1_39, %c0_40, %c0_41] : memref<4x32x8xf32, #tpu.memory_space<vmem>>, vector<1x32x8xf32>
    %60 = vector.shape_cast %59 : vector<1x32x8xf32> to vector<32x8xf32>
    %cst_42 = arith.constant dense<0.000000e+00> : vector<5x8xf32>
    %61 = tpu.matmul %25, %60, %cst_42 {dimension_numbers = #tpu.dot_dimension_numbers<[1], [0], [0], [1], [0, 0, 1, 1], [], []>} : vector<5x32xf32>, vector<32x8xf32>, vector<5x8xf32> -> vector<5x8xf32>
    %cst_43 = arith.constant dense<0.000000e+00> : vector<5x5xf32>
    %62 = tpu.matmul %55, %58, %cst_43 {dimension_numbers = #tpu.dot_dimension_numbers<[1], [1], [0], [0], [0, 0, 1, 0], [], []>} : vector<5x8xf32>, vector<5x8xf32>, vector<5x5xf32> -> vector<5x5xf32>
    %cst_44 = arith.constant 0.176776692 : f32
    %63 = vector.broadcast %cst_44 : f32 to vector<5x5xf32>
    %64 = arith.mulf %62, %63 : vector<5x5xf32>
    %cst_45 = arith.constant dense<0xFF800000> : vector<5xf32>
    %65 = vector.multi_reduction <maximumf>, %64, %cst_45 [1] : vector<5x5xf32> to vector<5xf32>
    %66 = vector.shape_cast %65 : vector<5xf32> to vector<5x1xf32>
    %67 = vector.broadcast %66 : vector<5x1xf32> to vector<5x5xf32>
    %68 = arith.subf %64, %67 : vector<5x5xf32>
    %69 = math.exp %68 : vector<5x5xf32>
    %cst_46 = arith.constant dense<0.000000e+00> : vector<5xf32>
    %70 = vector.multi_reduction <add>, %69, %cst_46 [1] : vector<5x5xf32> to vector<5xf32>
    %71 = vector.shape_cast %70 : vector<5xf32> to vector<5x1xf32>
    %72 = vector.broadcast %71 : vector<5x1xf32> to vector<5x5xf32>
    %73 = arith.divf %69, %72 : vector<5x5xf32>
    %cst_47 = arith.constant dense<0.000000e+00> : vector<5x8xf32>
    %74 = tpu.matmul %73, %61, %cst_47 {dimension_numbers = #tpu.dot_dimension_numbers<[1], [0], [0], [1], [0, 0, 1, 1], [], []>} : vector<5x5xf32>, vector<5x8xf32>, vector<5x8xf32> -> vector<5x8xf32>
    %c1_48 = arith.constant 1 : index
    %c0_49 = arith.constant 0 : index
    %c0_50 = arith.constant 0 : index
    %75 = vector.load %arg7[%c1_48, %c0_49, %c0_50] : memref<4x8x32xf32, #tpu.memory_space<vmem>>, vector<1x8x32xf32>
    %76 = vector.shape_cast %75 : vector<1x8x32xf32> to vector<8x32xf32>
    %cst_51 = arith.constant dense<0.000000e+00> : vector<5x32xf32>
    %77 = tpu.matmul %74, %76, %cst_51 {dimension_numbers = #tpu.dot_dimension_numbers<[1], [0], [0], [1], [0, 0, 1, 1], [], []>} : vector<5x8xf32>, vector<8x32xf32>, vector<5x32xf32> -> vector<5x32xf32>
    %78 = arith.addf %52, %77 : vector<5x32xf32>
    %c2 = arith.constant 2 : index
    %c0_52 = arith.constant 0 : index
    %c0_53 = arith.constant 0 : index
    %79 = vector.load %arg4[%c2, %c0_52, %c0_53] : memref<4x32x8xf32, #tpu.memory_space<vmem>>, vector<1x32x8xf32>
    %80 = vector.shape_cast %79 : vector<1x32x8xf32> to vector<32x8xf32>
    %cst_54 = arith.constant dense<0.000000e+00> : vector<5x8xf32>
    %81 = tpu.matmul %25, %80, %cst_54 {dimension_numbers = #tpu.dot_dimension_numbers<[1], [0], [0], [1], [0, 0, 1, 1], [], []>} : vector<5x32xf32>, vector<32x8xf32>, vector<5x8xf32> -> vector<5x8xf32>
    %c2_55 = arith.constant 2 : index
    %c0_56 = arith.constant 0 : index
    %c0_57 = arith.constant 0 : index
    %82 = vector.load %arg5[%c2_55, %c0_56, %c0_57] : memref<4x32x8xf32, #tpu.memory_space<vmem>>, vector<1x32x8xf32>
    %83 = vector.shape_cast %82 : vector<1x32x8xf32> to vector<32x8xf32>
    %cst_58 = arith.constant dense<0.000000e+00> : vector<5x8xf32>
    %84 = tpu.matmul %25, %83, %cst_58 {dimension_numbers = #tpu.dot_dimension_numbers<[1], [0], [0], [1], [0, 0, 1, 1], [], []>} : vector<5x32xf32>, vector<32x8xf32>, vector<5x8xf32> -> vector<5x8xf32>
    %c2_59 = arith.constant 2 : index
    %c0_60 = arith.constant 0 : index
    %c0_61 = arith.constant 0 : index
    %85 = vector.load %arg6[%c2_59, %c0_60, %c0_61] : memref<4x32x8xf32, #tpu.memory_space<vmem>>, vector<1x32x8xf32>
    %86 = vector.shape_cast %85 : vector<1x32x8xf32> to vector<32x8xf32>
    %cst_62 = arith.constant dense<0.000000e+00> : vector<5x8xf32>
    %87 = tpu.matmul %25, %86, %cst_62 {dimension_numbers = #tpu.dot_dimension_numbers<[1], [0], [0], [1], [0, 0, 1, 1], [], []>} : vector<5x32xf32>, vector<32x8xf32>, vector<5x8xf32> -> vector<5x8xf32>
    %cst_63 = arith.constant dense<0.000000e+00> : vector<5x5xf32>
    %88 = tpu.matmul %81, %84, %cst_63 {dimension_numbers = #tpu.dot_dimension_numbers<[1], [1], [0], [0], [0, 0, 1, 0], [], []>} : vector<5x8xf32>, vector<5x8xf32>, vector<5x5xf32> -> vector<5x5xf32>
    %cst_64 = arith.constant 0.176776692 : f32
    %89 = vector.broadcast %cst_64 : f32 to vector<5x5xf32>
    %90 = arith.mulf %88, %89 : vector<5x5xf32>
    %cst_65 = arith.constant dense<0xFF800000> : vector<5xf32>
    %91 = vector.multi_reduction <maximumf>, %90, %cst_65 [1] : vector<5x5xf32> to vector<5xf32>
    %92 = vector.shape_cast %91 : vector<5xf32> to vector<5x1xf32>
    %93 = vector.broadcast %92 : vector<5x1xf32> to vector<5x5xf32>
    %94 = arith.subf %90, %93 : vector<5x5xf32>
    %95 = math.exp %94 : vector<5x5xf32>
    %cst_66 = arith.constant dense<0.000000e+00> : vector<5xf32>
    %96 = vector.multi_reduction <add>, %95, %cst_66 [1] : vector<5x5xf32> to vector<5xf32>
    %97 = vector.shape_cast %96 : vector<5xf32> to vector<5x1xf32>
    %98 = vector.broadcast %97 : vector<5x1xf32> to vector<5x5xf32>
    %99 = arith.divf %95, %98 : vector<5x5xf32>
    %cst_67 = arith.constant dense<0.000000e+00> : vector<5x8xf32>
    %100 = tpu.matmul %99, %87, %cst_67 {dimension_numbers = #tpu.dot_dimension_numbers<[1], [0], [0], [1], [0, 0, 1, 1], [], []>} : vector<5x5xf32>, vector<5x8xf32>, vector<5x8xf32> -> vector<5x8xf32>
    %c2_68 = arith.constant 2 : index
    %c0_69 = arith.constant 0 : index
    %c0_70 = arith.constant 0 : index
    %101 = vector.load %arg7[%c2_68, %c0_69, %c0_70] : memref<4x8x32xf32, #tpu.memory_space<vmem>>, vector<1x8x32xf32>
    %102 = vector.shape_cast %101 : vector<1x8x32xf32> to vector<8x32xf32>
    %cst_71 = arith.constant dense<0.000000e+00> : vector<5x32xf32>
    %103 = tpu.matmul %100, %102, %cst_71 {dimension_numbers = #tpu.dot_dimension_numbers<[1], [0], [0], [1], [0, 0, 1, 1], [], []>} : vector<5x8xf32>, vector<8x32xf32>, vector<5x32xf32> -> vector<5x32xf32>
    %104 = arith.addf %78, %103 : vector<5x32xf32>
    %c3 = arith.constant 3 : index
    %c0_72 = arith.constant 0 : index
    %c0_73 = arith.constant 0 : index
    %105 = vector.load %arg4[%c3, %c0_72, %c0_73] : memref<4x32x8xf32, #tpu.memory_space<vmem>>, vector<1x32x8xf32>
    %106 = vector.shape_cast %105 : vector<1x32x8xf32> to vector<32x8xf32>
    %cst_74 = arith.constant dense<0.000000e+00> : vector<5x8xf32>
    %107 = tpu.matmul %25, %106, %cst_74 {dimension_numbers = #tpu.dot_dimension_numbers<[1], [0], [0], [1], [0, 0, 1, 1], [], []>} : vector<5x32xf32>, vector<32x8xf32>, vector<5x8xf32> -> vector<5x8xf32>
    %c3_75 = arith.constant 3 : index
    %c0_76 = arith.constant 0 : index
    %c0_77 = arith.constant 0 : index
    %108 = vector.load %arg5[%c3_75, %c0_76, %c0_77] : memref<4x32x8xf32, #tpu.memory_space<vmem>>, vector<1x32x8xf32>
    %109 = vector.shape_cast %108 : vector<1x32x8xf32> to vector<32x8xf32>
    %cst_78 = arith.constant dense<0.000000e+00> : vector<5x8xf32>
    %110 = tpu.matmul %25, %109, %cst_78 {dimension_numbers = #tpu.dot_dimension_numbers<[1], [0], [0], [1], [0, 0, 1, 1], [], []>} : vector<5x32xf32>, vector<32x8xf32>, vector<5x8xf32> -> vector<5x8xf32>
    %c3_79 = arith.constant 3 : index
    %c0_80 = arith.constant 0 : index
    %c0_81 = arith.constant 0 : index
    %111 = vector.load %arg6[%c3_79, %c0_80, %c0_81] : memref<4x32x8xf32, #tpu.memory_space<vmem>>, vector<1x32x8xf32>
    %112 = vector.shape_cast %111 : vector<1x32x8xf32> to vector<32x8xf32>
    %cst_82 = arith.constant dense<0.000000e+00> : vector<5x8xf32>
    %113 = tpu.matmul %25, %112, %cst_82 {dimension_numbers = #tpu.dot_dimension_numbers<[1], [0], [0], [1], [0, 0, 1, 1], [], []>} : vector<5x32xf32>, vector<32x8xf32>, vector<5x8xf32> -> vector<5x8xf32>
    %cst_83 = arith.constant dense<0.000000e+00> : vector<5x5xf32>
    %114 = tpu.matmul %107, %110, %cst_83 {dimension_numbers = #tpu.dot_dimension_numbers<[1], [1], [0], [0], [0, 0, 1, 0], [], []>} : vector<5x8xf32>, vector<5x8xf32>, vector<5x5xf32> -> vector<5x5xf32>
    %cst_84 = arith.constant 0.176776692 : f32
    %115 = vector.broadcast %cst_84 : f32 to vector<5x5xf32>
    %116 = arith.mulf %114, %115 : vector<5x5xf32>
    %cst_85 = arith.constant dense<0xFF800000> : vector<5xf32>
    %117 = vector.multi_reduction <maximumf>, %116, %cst_85 [1] : vector<5x5xf32> to vector<5xf32>
    %118 = vector.shape_cast %117 : vector<5xf32> to vector<5x1xf32>
    %119 = vector.broadcast %118 : vector<5x1xf32> to vector<5x5xf32>
    %120 = arith.subf %116, %119 : vector<5x5xf32>
    %121 = math.exp %120 : vector<5x5xf32>
    %cst_86 = arith.constant dense<0.000000e+00> : vector<5xf32>
    %122 = vector.multi_reduction <add>, %121, %cst_86 [1] : vector<5x5xf32> to vector<5xf32>
    %123 = vector.shape_cast %122 : vector<5xf32> to vector<5x1xf32>
    %124 = vector.broadcast %123 : vector<5x1xf32> to vector<5x5xf32>
    %125 = arith.divf %121, %124 : vector<5x5xf32>
    %cst_87 = arith.constant dense<0.000000e+00> : vector<5x8xf32>
    %126 = tpu.matmul %125, %113, %cst_87 {dimension_numbers = #tpu.dot_dimension_numbers<[1], [0], [0], [1], [0, 0, 1, 1], [], []>} : vector<5x5xf32>, vector<5x8xf32>, vector<5x8xf32> -> vector<5x8xf32>
    %c3_88 = arith.constant 3 : index
    %c0_89 = arith.constant 0 : index
    %c0_90 = arith.constant 0 : index
    %127 = vector.load %arg7[%c3_88, %c0_89, %c0_90] : memref<4x8x32xf32, #tpu.memory_space<vmem>>, vector<1x8x32xf32>
    %128 = vector.shape_cast %127 : vector<1x8x32xf32> to vector<8x32xf32>
    %cst_91 = arith.constant dense<0.000000e+00> : vector<5x32xf32>
    %129 = tpu.matmul %126, %128, %cst_91 {dimension_numbers = #tpu.dot_dimension_numbers<[1], [0], [0], [1], [0, 0, 1, 1], [], []>} : vector<5x8xf32>, vector<8x32xf32>, vector<5x32xf32> -> vector<5x32xf32>
    %130 = arith.addf %104, %129 : vector<5x32xf32>
    %131 = arith.addf %1, %130 : vector<5x32xf32>
    %c0_92 = arith.constant 0 : index
    %c0_93 = arith.constant 0 : index
    %132 = vector.load %arg8[%c0_92, %c0_93] : memref<1x32xf32, #tpu.memory_space<vmem>>, vector<1x32xf32>
    %133 = vector.broadcast %132 : vector<1x32xf32> to vector<5x32xf32>
    %134 = arith.addf %131, %133 : vector<5x32xf32>
    %cst_94 = arith.constant dense<0.000000e+00> : vector<5xf32>
    %135 = vector.multi_reduction <add>, %134, %cst_94 [1] : vector<5x32xf32> to vector<5xf32>
    %136 = vector.shape_cast %135 : vector<5xf32> to vector<5x1xf32>
    %cst_95 = arith.constant 3.200000e+01 : f32
    %137 = vector.broadcast %cst_95 : f32 to vector<5x1xf32>
    %138 = arith.divf %136, %137 : vector<5x1xf32>
    %139 = vector.broadcast %138 : vector<5x1xf32> to vector<5x32xf32>
    %140 = arith.subf %134, %139 : vector<5x32xf32>
    %141 = arith.mulf %140, %140 : vector<5x32xf32>
    %cst_96 = arith.constant dense<0.000000e+00> : vector<5xf32>
    %142 = vector.multi_reduction <add>, %141, %cst_96 [1] : vector<5x32xf32> to vector<5xf32>
    %143 = vector.shape_cast %142 : vector<5xf32> to vector<5x1xf32>
    %cst_97 = arith.constant 3.200000e+01 : f32
    %144 = vector.broadcast %cst_97 : f32 to vector<5x1xf32>
    %145 = arith.divf %143, %144 : vector<5x1xf32>
    %146 = vector.broadcast %138 : vector<5x1xf32> to vector<5x32xf32>
    %147 = arith.subf %134, %146 : vector<5x32xf32>
    %cst_98 = arith.constant 9.99999974E-6 : f32
    %148 = vector.broadcast %cst_98 : f32 to vector<5x1xf32>
    %149 = arith.addf %145, %148 : vector<5x1xf32>
    %150 = math.rsqrt %149 : vector<5x1xf32>
    %151 = vector.broadcast %150 : vector<5x1xf32> to vector<5x32xf32>
    %152 = arith.mulf %147, %151 : vector<5x32xf32>
    %c0_99 = arith.constant 0 : index
    %c0_100 = arith.constant 0 : index
    %153 = vector.load %arg9[%c0_99, %c0_100] : memref<1x32xf32, #tpu.memory_space<vmem>>, vector<1x32xf32>
    %154 = vector.broadcast %153 : vector<1x32xf32> to vector<5x32xf32>
    %155 = arith.mulf %152, %154 : vector<5x32xf32>
    %c0_101 = arith.constant 0 : index
    %c0_102 = arith.constant 0 : index
    %156 = vector.load %arg10[%c0_101, %c0_102] : memref<1x32xf32, #tpu.memory_space<vmem>>, vector<1x32xf32>
    %157 = vector.broadcast %156 : vector<1x32xf32> to vector<5x32xf32>
    %158 = arith.addf %155, %157 : vector<5x32xf32>
    %c0_103 = arith.constant 0 : index
    %c0_104 = arith.constant 0 : index
    %159 = vector.load %arg11[%c0_103, %c0_104] : memref<32x32xf32, #tpu.memory_space<vmem>>, vector<32x32xf32>
    %cst_105 = arith.constant dense<0.000000e+00> : vector<5x32xf32>
    %160 = tpu.matmul %158, %159, %cst_105 {dimension_numbers = #tpu.dot_dimension_numbers<[1], [0], [0], [1], [0, 0, 1, 1], [], []>} : vector<5x32xf32>, vector<32x32xf32>, vector<5x32xf32> -> vector<5x32xf32>
    %c0_106 = arith.constant 0 : index
    %c0_107 = arith.constant 0 : index
    %161 = vector.load %arg12[%c0_106, %c0_107] : memref<1x32xf32, #tpu.memory_space<vmem>>, vector<1x32xf32>
    %162 = vector.broadcast %161 : vector<1x32xf32> to vector<5x32xf32>
    %163 = arith.addf %160, %162 : vector<5x32xf32>
    %164 = arith.mulf %163, %163 : vector<5x32xf32>
    %165 = arith.mulf %163, %164 : vector<5x32xf32>
    %cst_108 = arith.constant 4.471500e-02 : f32
    %166 = vector.broadcast %cst_108 : f32 to vector<5x32xf32>
    %167 = arith.mulf %166, %165 : vector<5x32xf32>
    %168 = arith.addf %163, %167 : vector<5x32xf32>
    %cst_109 = arith.constant 0.797884583 : f32
    %169 = vector.broadcast %cst_109 : f32 to vector<5x32xf32>
    %170 = arith.mulf %169, %168 : vector<5x32xf32>
    %171 = math.tanh %170 : vector<5x32xf32>
    %cst_110 = arith.constant 1.000000e+00 : f32
    %172 = vector.broadcast %cst_110 : f32 to vector<5x32xf32>
    %173 = arith.addf %172, %171 : vector<5x32xf32>
    %cst_111 = arith.constant 5.000000e-01 : f32
    %174 = vector.broadcast %cst_111 : f32 to vector<5x32xf32>
    %175 = arith.mulf %174, %173 : vector<5x32xf32>
    %176 = arith.mulf %163, %175 : vector<5x32xf32>
    %c0_112 = arith.constant 0 : index
    %c0_113 = arith.constant 0 : index
    %177 = vector.load %arg13[%c0_112, %c0_113] : memref<32x32xf32, #tpu.memory_space<vmem>>, vector<32x32xf32>
    %cst_114 = arith.constant dense<0.000000e+00> : vector<5x32xf32>
    %178 = tpu.matmul %176, %177, %cst_114 {dimension_numbers = #tpu.dot_dimension_numbers<[1], [0], [0], [1], [0, 0, 1, 1], [], []>} : vector<5x32xf32>, vector<32x32xf32>, vector<5x32xf32> -> vector<5x32xf32>
    %c0_115 = arith.constant 0 : index
    %c0_116 = arith.constant 0 : index
    %179 = vector.load %arg14[%c0_115, %c0_116] : memref<1x32xf32, #tpu.memory_space<vmem>>, vector<1x32xf32>
    %180 = vector.broadcast %179 : vector<1x32xf32> to vector<5x32xf32>
    %181 = arith.addf %178, %180 : vector<5x32xf32>
    %182 = arith.addf %134, %181 : vector<5x32xf32>
    %c0_117 = arith.constant 0 : index
    %c0_118 = arith.constant 0 : index
    %c0_119 = arith.constant 0 : index
    %183 = vector.load %arg15[%c0_117, %c0_118, %c0_119] : memref<1x5x32xf32, #tpu.memory_space<vmem>>, vector<1x5x32xf32>
    %184 = vector.shape_cast %183 : vector<1x5x32xf32> to vector<5x32xf32>
    %185 = vector.shape_cast %182 : vector<5x32xf32> to vector<1x5x32xf32>
    tpu.vector_store %arg15[%c0_117, %c0_118, %c0_119], %185 {strides = array<i32>} : memref<1x5x32xf32, #tpu.memory_space<vmem>>, vector<1x5x32xf32>,
    return
  }
  func.func @transform_0(%arg0: i32) -> (i32, i32, i32) {
    %c0_i32 = arith.constant 0 : i32
    %c0_i32_0 = arith.constant 0 : i32
    %c0_i32_1 = arith.constant 0 : i32
    return %arg0, %c0_i32, %c0_i32_0 : i32, i32, i32
  }
  func.func @transform_1(%arg0: i32) -> (i32, i32) {
    %c0_i32 = arith.constant 0 : i32
    %c0_i32_0 = arith.constant 0 : i32
    %c0_i32_1 = arith.constant 0 : i32
    return %c0_i32, %c0_i32_0 : i32, i32
  }
  func.func @transform_2(%arg0: i32) -> (i32, i32) {
    %c0_i32 = arith.constant 0 : i32
    %c0_i32_0 = arith.constant 0 : i32
    %c0_i32_1 = arith.constant 0 : i32
    return %c0_i32, %c0_i32_0 : i32, i32
  }
  func.func @transform_3(%arg0: i32) -> (i32, i32, i32) {
    %c0_i32 = arith.constant 0 : i32
    %c0_i32_0 = arith.constant 0 : i32
    %c0_i32_1 = arith.constant 0 : i32
    %c0_i32_2 = arith.constant 0 : i32
    return %c0_i32, %c0_i32_0, %c0_i32_1 : i32, i32, i32
  }
  func.func @transform_4(%arg0: i32) -> (i32, i32, i32) {
    %c0_i32 = arith.constant 0 : i32
    %c0_i32_0 = arith.constant 0 : i32
    %c0_i32_1 = arith.constant 0 : i32
    %c0_i32_2 = arith.constant 0 : i32
    return %c0_i32, %c0_i32_0, %c0_i32_1 : i32, i32, i32
  }
  func.func @transform_5(%arg0: i32) -> (i32, i32, i32) {
    %c0_i32 = arith.constant 0 : i32
    %c0_i32_0 = arith.constant 0 : i32
    %c0_i32_1 = arith.constant 0 : i32
    %c0_i32_2 = arith.constant 0 : i32
    return %c0_i32, %c0_i32_0, %c0_i32_1 : i32, i32, i32
  }
  func.func @transform_6(%arg0: i32) -> (i32, i32, i32) {
    %c0_i32 = arith.constant 0 : i32
    %c0_i32_0 = arith.constant 0 : i32
    %c0_i32_1 = arith.constant 0 : i32
    %c0_i32_2 = arith.constant 0 : i32
    return %c0_i32, %c0_i32_0, %c0_i32_1 : i32, i32, i32
  }
  func.func @transform_7(%arg0: i32) -> (i32, i32) {
    %c0_i32 = arith.constant 0 : i32
    %c0_i32_0 = arith.constant 0 : i32
    %c0_i32_1 = arith.constant 0 : i32
    return %c0_i32, %c0_i32_0 : i32, i32
  }
  func.func @transform_8(%arg0: i32) -> (i32, i32) {
    %c0_i32 = arith.constant 0 : i32
    %c0_i32_0 = arith.constant 0 : i32
    %c0_i32_1 = arith.constant 0 : i32
    return %c0_i32, %c0_i32_0 : i32, i32
  }
  func.func @transform_9(%arg0: i32) -> (i32, i32) {
    %c0_i32 = arith.constant 0 : i32
    %c0_i32_0 = arith.constant 0 : i32
    %c0_i32_1 = arith.constant 0 : i32
    return %c0_i32, %c0_i32_0 : i32, i32
  }
  func.func @transform_10(%arg0: i32) -> (i32, i32) {
    %c0_i32 = arith.constant 0 : i32
    %c0_i32_0 = arith.constant 0 : i32
    %c0_i32_1 = arith.constant 0 : i32
    return %c0_i32, %c0_i32_0 : i32, i32
  }
  func.func @transform_11(%arg0: i32) -> (i32, i32) {
    %c0_i32 = arith.constant 0 : i32
    %c0_i32_0 = arith.constant 0 : i32
    %c0_i32_1 = arith.constant 0 : i32
    return %c0_i32, %c0_i32_0 : i32, i32
  }
  func.func @transform_12(%arg0: i32) -> (i32, i32) {
    %c0_i32 = arith.constant 0 : i32
    %c0_i32_0 = arith.constant 0 : i32
    %c0_i32_1 = arith.constant 0 : i32
    return %c0_i32, %c0_i32_0 : i32, i32
  }
  func.func @transform_13(%arg0: i32) -> (i32, i32) {
    %c0_i32 = arith.constant 0 : i32
    %c0_i32_0 = arith.constant 0 : i32
    %c0_i32_1 = arith.constant 0 : i32
    return %c0_i32, %c0_i32_0 : i32, i32
  }
  func.func @transform_14(%arg0: i32) -> (i32, i32, i32) {
    %c0_i32 = arith.constant 0 : i32
    %c0_i32_0 = arith.constant 0 : i32
    %c0_i32_1 = arith.constant 0 : i32
    return %arg0, %c0_i32, %c0_i32_0 : i32, i32, i32
  }
}

</mosaic_0001>

<bundles_post_ra>
// kernel: set_forward.7
= control target key start
LH: loop header
LB: loop body
LE: loop exit
PB: predicated region body
PF: predicated region fallthrough
CT: control target
= control target key end

     0   :  { %s137_s0 = inlined_call_operand.vmem [shape: f32[2,32], index: 0, kind: input, shape index: {}]   ;;  %s138_s1 = inlined_call_operand.vmem [shape: f32[32,10], index: 1, kind: input, shape index: {}]   ;;  %s139_s2 = inlined_call_operand.vmem [shape: f32[1,10], index: 2, kind: input, shape index: {}]   ;;  %s140_s3 = inlined_call_operand.hbm [shape: f32[2,10], index: 3, kind: output, shape index: {}]  }
   0x1   :  { %v19_v0 = vld [vmem:[%s138_s1 + $0x18] sm:$0xff]  ;;  %v18_v1 = vld [vmem:[%s138_s1 + $0x10] sm:$0xff]  ;;  %v17_v2 = vld [vmem:[%s138_s1 + $0x8] sm:$0xff] }
   0x2   :  { %40 = vmatpush.msra.mxu0 %v19_v0 }
   0x3   :  { %8 = vsyncpa [#allocation3], 0  ;;  %v16_v3 = vld [vmem:[%s138_s1] sm:$0xff]  ;;  %vm24_vm0 = vcmask 261120   ;;  %s95_s24 = smov [#allocation2]   ;;  %s57_s28 = sshll.u32 %s140_s3, 4  ;;  %s58_s28 = int_to_ptr.hbm [resolvable:$true] %s57_s28 }
   0x4   :  { %41 = vmatpush.msra.mxu0 %v18_v1  ;;  %v15_v4 = vld [vmem:[%s137_s0] sm:$0x3]  ;;  %s55_s25 = sshll.u32 %s95_s24, 4  ;;  %vm48_vm1 = vcmask 74752   ;;  %s56_s25 = int_to_ptr.vmem [resolvable:$true] %s55_s25 }
   0x5   :  { %v68_v5 = vld [vmem:[%s139_s2] ss:$0 sm:$0xff] }
   0x6   :  { %42 = vmatpush.msra.mxu0 %v17_v2 }
   0x8   :  { %43 = vmatpush.msra.mxu0 %v16_v3 }
   0x9   :  { %66 = vmatmul.msk.f32.vlgmr.msra.gmra.mxu0 %vm24_vm0, %v15_v4 }
  0x86   :  { %v45_v6 = vpop.f32.mrf.mxu0 }
  0x87   :  { %v46_v7 = vadd.f32 %v68_v5, %v45_v6 }
  0x89   :  { %49 = vst.msk [vmem:[#allocation2] sm:$0x3] %vm48_vm1, %v46_v7 }
  0x8a   :  { %60 = dma.vmem_to_hbm [thread:$0]  %s56_s25, 32, %s58_s28, [#allocation3]  }
  0x8b   :  { %93 = dma.done.wait [#allocation3], 32  }
  0x8c   :  { %94 = vsyncadd [#allocation3], 4294967264 }
  0x8d   :  { %65 = vsyncpa [#allocation3], 1 }

// kernel: set_forward.4
= control target key start
LH: loop header
LB: loop body
LE: loop exit
PB: predicated region body
PF: predicated region fallthrough
CT: control target
= control target key end

     0   :  { %s375_s18 = smov 0   ;;  %s404_s0 = inlined_call_operand.vmem [shape: f32[2,4,4], index: 0, kind: input, shape index: {}]   ;;  %s405_s1 = inlined_call_operand.vmem [shape: f32[4,32], index: 1, kind: input, shape index: {}]   ;;  %s406_s2 = inlined_call_operand.vmem [shape: f32[1,32], index: 2, kind: input, shape index: {}]   ;;  %s407_s3 = inlined_call_operand.vmem [shape: f32[1,32], index: 3, kind: input, shape index: {}]   ;;  %s408_s4 = inlined_call_operand.vmem [shape: f32[5,32], index: 4, kind: input, shape index: {}]   ;;  %s409_s5 = inlined_call_operand.vmem [shape: f32[2,5,32], index: 5, kind: output, shape index: {}]  }
   0x1 LB: > { %s317_s19 = sadd.s32 4294967295, %s343_s18   ;;  %p321_p0 = scmp.ge.s32.totalorder %s343_s18, 1  ;;  %s343_s18 = sphi %s375_s18, %s15_s18  }
   0x2   : > { %p186_p1 = scmp.lt.s32.totalorder %s343_s18, 3 }
   0x4   : > { %p187_p2 = pnand %p321_p0, %p186_p1 }
   0x5   : > { %p212_p3 = scmp.lt.s32.totalorder (!%p187_p2), %s317_s19, 1 }
   0x6   : > { %190 = sbr.rel (%p187_p2) target bundleno = 149 (0x95), region = 40 }
   0xb   : > { %v221_v0 = vld [vmem:[%s405_s1] sm:$0xf]  ;;  %vm230_vm0 = vcmask 1043456   ;;  %s411_s19 = smov (!%p212_p3, %s317_s19), 1  ;;  %vm226_vm1 = vcmask 31744   ;;  %vm258_vm2 = vcmask 1040384  }
   0xc   : > { %324 = vmatpush.msk.msra.mxu0 %vm230_vm0, %v221_v0  ;;  %s322_s22 = sshll.u32 %s411_s19, 2  ;;  %v336_v2 = vld [vmem:[%s406_s2] ss:$0 sm:$0xff]  ;;  %s323_s28 = sshll.u32 %s411_s19, 3  ;;  %vm262_vm3 = vcmask 258048  }
   0xd   : > { %s215_s25 = scalar_lea.vmem %s404_s0, %s322_s22  ;;  %v254_v5 = vld [vmem:[%s407_s3] sm:$0x1]  ;;  %s219_s10 = scalar_lea.vmem %s409_s5, %s323_s28 }
   0xe   : > { %v220_v1 = vld [vmem:[%s215_s25] sm:$0xf] }
   0xf   : > { %325 = vmatmul.msk.f32.vlgmr.msra.gmra.mxu0 %vm226_vm1, %v220_v1  ;;  %v260_v7 = vld [vmem:[%s408_s4] sm:$0x1f] }
  0x8c   : > { %v251_v3 = vpop.f32.mrf.mxu0 }
  0x8d   : > { %v252_v4 = vadd.f32 %v336_v2, %v251_v3 }
  0x8f   : > { %v256_v6 = vrot.slane %v252_v4, 7 }
  0x91   : > { %v259_v8 = vsel %vm258_vm2, %v254_v5, %v256_v6 }
  0x92   : > { %v261_v9 = vadd.f32 %v260_v7, %v259_v8 }
  0x94   : > { %263 = vst.msk [vmem:[%s219_s10] sm:$0x1f] %vm262_vm3, %v261_v9 }
  0x95 PF: > { %s15_s18 = sadd.s32 1, %s343_s18  }
  0x96   : > { %p12_p4 = scmp.ge.s32.totalorder %s15_s18, 4  }
  0x98   :  { %14 = sbr.rel (!%p12_p4) target bundleno = 1 (0x1), region = 70 }

// kernel: set_forward.5
= control target key start
LH: loop header
LB: loop body
LE: loop exit
PB: predicated region body
PF: predicated region fallthrough
CT: control target
= control target key end

     0   :  { %s1588_s29 = smov 0   ;;  %s1895_s0 = inlined_call_operand.vmem [shape: f32[2,5,32], index: 0, kind: input, shape index: {}]   ;;  %s1896_s1 = inlined_call_operand.vmem [shape: f32[1,32], index: 1, kind: input, shape index: {}]   ;;  %s1897_s2 = inlined_call_operand.vmem [shape: f32[1,32], index: 2, kind: input, shape index: {}]   ;;  %s1898_s3 = inlined_call_operand.vmem [shape: f32[4,32,8], index: 3, kind: input, shape index: {}]   ;;  %s1899_s4 = inlined_call_operand.vmem [shape: f32[4,32,8], index: 4, kind: input, shape index: {}]   ;;  %s1900_s5 = inlined_call_operand.vmem [shape: f32[4,32,8], index: 5, kind: input, shape index: {}]   ;;  %s1901_s6 = inlined_call_operand.vmem [shape: f32[4,8,32], index: 6, kind: input, shape index: {}]   ;;  %s1902_s7 = inlined_call_operand.vmem [shape: f32[1,32], index: 7, kind: input, shape index: {}]   ;;  %s1903_s8 = inlined_call_operand.vmem [shape: f32[1,32], index: 8, kind: input, shape index: {}]   ;;  %s1904_s9 = inlined_call_operand.vmem [shape: f32[1,32], index: 9, kind: input, shape index: {}]   ;;  %s1905_s10 = inlined_call_operand.vmem [shape: f32[32,32], index: 10, kind: input, shape index: {}]   ;;  %s1906_s11 = inlined_call_operand.vmem [shape: f32[1,32], index: 11, kind: input, shape index: {}]   ;;  %s1907_s12 = inlined_call_operand.vmem [shape: f32[32,32], index: 12, kind: input, shape index: {}]   ;;  %s1908_s13 = inlined_call_operand.vmem [shape: f32[1,32], index: 13, kind: input, shape index: {}]   ;;  %s1909_s14 = inlined_call_operand.vmem [shape: f32[2,5,32], index: 14, kind: output, shape index: {}]  }
   0x1 LB: > { %s1382_s30 = sadd.s32 4294967295, %s1510_s29   ;;  %p1386_p0 = scmp.ge.s32.totalorder %s1510_s29, 1  ;;  %s1510_s29 = sphi %s1588_s29, %s24_s29  }
   0x2   : > { %p411_p1 = scmp.lt.s32.totalorder %s1510_s29, 3 }
   0x4   : > { %p412_p2 = pnand %p1386_p0, %p411_p1 }
   0x5   : > { %p455_p3 = scmp.lt.s32.totalorder (!%p412_p2), %s1382_s30, 1 }
   0x6   : > { %415 = sbr.rel (%p412_p2) target bundleno = 3103 (0xc1f), region = 76 }
   0xb   : > { %s1911_s30 = smov (!%p455_p3, %s1382_s30), 1  ;;  %vm464_vm0 = vcmask 258048   ;;  %v1512_v2 = vmov 32.0   ;;  %v507_v14 = vld [vmem:[%s1898_s3 + $0x18] sm:$0xff]  ;;  %v506_v17 = vld [vmem:[%s1898_s3 + $0x10] sm:$0xff]  ;;  %v505_v20 = vld [vmem:[%s1898_s3 + $0x8] sm:$0xff] }
   0xc   : > { %s1387_s15 = sshll.u32 %s1911_s30, 3  ;;  %1480 = vrcp.f32 %v1512_v2  ;;  %v535_v15 = vld [vmem:[%s1899_s4 + $0x18] sm:$0xff]  ;;  %524 = vmatpush.msra.mxu0 %v507_v14  ;;  %v534_v18 = vld [vmem:[%s1899_s4 + $0x10] sm:$0xff]  ;;  %v533_v21 = vld [vmem:[%s1899_s4 + $0x8] sm:$0xff]  ;;  %vm508_vm5 = vcmask 261120   ;;  %vm580_vm6 = vcmask 64512  }
   0xd   : > { %s458_s18 = scalar_lea.vmem %s1895_s0, %s1387_s15  ;;  %v559_v16 = vld [vmem:[%s1900_s5 + $0x18] sm:$0xff]  ;;  %548 = vmatpush.msra.mxu1 %v535_v15  ;;  %v558_v19 = vld [vmem:[%s1900_s5 + $0x10] sm:$0xff]  ;;  %v557_v22 = vld [vmem:[%s1900_s5 + $0x8] sm:$0xff]  ;;  %vm637_vm7 = vcmask 1044480   ;;  %vm608_vm8 = vcmask 36864   ;;  %vm633_vm13 = vcmask 39936   ;;  %s462_s25 = scalar_lea.vmem %s1909_s14, %s1387_s15 }
   0xe   : > { %v1604_v0 = vld [vmem:[%s458_s18] sm:$0x1f]  ;;  %572 = vmatpush.msra.mxu2 %v559_v16  ;;  %525 = vmatpush.msra.mxu0 %v506_v17  ;;  %v1399_v26 = vld [vmem:[%s1898_s3 + $0x38] sm:$0xff]  ;;  %v1398_v29 = vld [vmem:[%s1898_s3 + $0x30] sm:$0xff] }
   0xf   : > { %v465_v1 = vsel %vm464_vm0, %v1604_v0, 0.0  ;;  %549 = vmatpush.msra.mxu1 %v534_v18  ;;  %v504_v23 = vld [vmem:[%s1898_s3] sm:$0xff]  ;;  %v1404_v27 = vld [vmem:[%s1899_s4 + $0x38] sm:$0xff]  ;;  %v1403_v30 = vld [vmem:[%s1899_s4 + $0x30] sm:$0xff] }
  0x10   : > { %466 = vadd.xlane.f32.xlu0 %v465_v1  ;;  %573 = vmatpush.msra.mxu2 %v558_v19  ;;  %v532_v24 = vld [vmem:[%s1899_s4] sm:$0xff]  ;;  %v1409_v28 = vld [vmem:[%s1900_s5 + $0x38] sm:$0xff]  ;;  %v1408_v31 = vld [vmem:[%s1900_s5 + $0x30] sm:$0xff] }
  0x11   : > { %526 = vmatpush.msra.mxu0 %v505_v20  ;;  %550 = vmatpush.msra.mxu1 %v533_v21  ;;  %v556_v25 = vld [vmem:[%s1900_s5] sm:$0xff]  ;;  %v1397_v33 = vld [vmem:[%s1898_s3 + $0x28] sm:$0xff]  ;;  %v1421_v16 = vld [vmem:[%s1898_s3 + $0x58] sm:$0xff] }
  0x12   : > { %v1481_v3 = vpop.eup %1480  ;;  %574 = vmatpush.msra.mxu2 %v557_v22  ;;  %v1402_v34 = vld [vmem:[%s1899_s4 + $0x28] sm:$0xff]  ;;  %v1396_v37 = vld [vmem:[%s1898_s3 + $0x20] sm:$0xff]  ;;  %v1420_v17 = vld [vmem:[%s1898_s3 + $0x50] sm:$0xff] }
  0x13   : > { %v469_v4 = vmul.f32 32.0, %v1481_v3  ;;  %vm473_vm1 = vweird.f32 %v1481_v3  ;;  %527 = vmatpush.msra.mxu0 %v504_v23  ;;  %551 = vmatpush.msra.mxu1 %v532_v24  ;;  %v1407_v36 = vld [vmem:[%s1900_s5 + $0x28] sm:$0xff]  ;;  %v1401_v38 = vld [vmem:[%s1899_s4 + $0x20] sm:$0xff] }
  0x14   : > { %575 = vmatpush.msra.mxu2 %v556_v25  ;;  %v1406_v40 = vld [vmem:[%s1900_s5 + $0x20] sm:$0xff]  ;;  %v1419_v18 = vld [vmem:[%s1898_s3 + $0x48] sm:$0xff] }
  0x15   : > { %v470_v5 = vsub.f32 1.0, %v469_v4  ;;  %679 = vmatpush.msrb.mxu0 %v1399_v26  ;;  %704 = vmatpush.msrb.mxu1 %v1404_v27  ;;  %v1473_v47 = vld [vmem:[%s1896_s1] ss:$0 sm:$0xff] }
  0x16   : > { %729 = vmatpush.msrb.mxu2 %v1409_v28  ;;  %v1474_v49 = vld [vmem:[%s1897_s2] ss:$0 sm:$0xff] }
  0x17   : > { %v471_v6 = vmul.f32 %v1481_v3, %v470_v5  ;;  %680 = vmatpush.msrb.mxu0 %v1398_v29  ;;  %705 = vmatpush.msrb.mxu1 %v1403_v30  ;;  %v1418_v19 = vld [vmem:[%s1898_s3 + $0x40] sm:$0xff] }
  0x18   : > { %730 = vmatpush.msrb.mxu2 %v1408_v31  ;;  %v661_v21 = vld [vmem:[%s1901_s6] sm:$0xff]  ;;  %v1426_v31 = vld [vmem:[%s1899_s4 + $0x58] sm:$0xff] }
  0x19   : > { %v472_v7 = vadd.f32 %v1481_v3, %v471_v6  ;;  %681 = vmatpush.msrb.mxu0 %v1397_v33  ;;  %706 = vmatpush.msrb.mxu1 %v1402_v34  ;;  %v1424_v33 = vld [vmem:[%s1899_s4 + $0x48] sm:$0xff]  ;;  %v1423_v34 = vld [vmem:[%s1899_s4 + $0x40] sm:$0xff] }
  0x1a   : > { %731 = vmatpush.msrb.mxu2 %v1407_v36 }
  0x1b   : > { %v1608_v8 = vsel %vm473_vm1, %v1481_v3, %v472_v7  ;;  %682 = vmatpush.msrb.mxu0 %v1396_v37  ;;  %707 = vmatpush.msrb.mxu1 %v1401_v38 }
  0x1c   : > { %732 = vmatpush.msrb.mxu2 %v1406_v40 }
  0x83   : > { %v467_v9 = vpop.xlane.xlu0 %466 }
  0x84   : > { %v475_v10 = vmul.f32 %v1608_v8, %v467_v9 }
  0x86   : > { %v1612_v11 = vsub.f32 %v1604_v0, %v475_v10 }
  0x88   : > { %v477_v12 = vmul.f32 %v1612_v11, %v1612_v11 }
  0x8a   : > { %v478_v13 = vsel %vm464_vm0, %v477_v12, 0.0 }
  0x8b   : > { %479 = vadd.xlane.f32.xlu0 %v478_v13 }
  0xfe   : > { %v480_v32 = vpop.xlane.xlu0 %479 }
  0xff   : > { %v481_v35 = vmul.f32 %v480_v32, %v1608_v8  ;;  %v1425_v32 = vld [vmem:[%s1899_s4 + $0x50] sm:$0xff] }
 0x101   : > { %v482_v39 = vadd.f32 1e-05, %v481_v35 }
 0x103   : > { %1482 = vrsqrt.f32 %v482_v39  ;;  %vm489_vm3 = vweird.f32 %v482_v39 }
 0x109   : > { %v1483_v41 = vpop.eup %1482 }
 0x10a   : > { %v484_v42 = vmul.f32 %v1483_v41, %v482_v39  ;;  %vm490_vm2 = vweird.f32 %v1483_v41 }
 0x10b   : > { %vm491_vm4 = vmor %vm489_vm3, %vm490_vm2 }
 0x10c   : > { %v485_v43 = vmul.f32 %v1483_v41, %v484_v42 }
 0x10e   : > { %v486_v44 = vmul.f32 0.5, %v485_v43 }
 0x110   : > { %v487_v45 = vsub.f32 1.5, %v486_v44 }
 0x112   : > { %v488_v46 = vmul.f32 %v1483_v41, %v487_v45 }
 0x114   : > { %v492_v48 = vsel %vm491_vm4, %v1483_v41, %v488_v46 }
 0x115   : > { %v493_v50 = vmul.f32 %v492_v48, %v1612_v11  ;;  %v1431_v48 = vld [vmem:[%s1900_s5 + $0x58] sm:$0xff] }
 0x117   : > { %v498_v51 = vmul.f32 %v1473_v47, %v493_v50  ;;  %v1415_v47 = vld [vmem:[%s1901_s6 + $0x8] sm:$0xff] }
 0x118   : > { %v1429_v50 = vld [vmem:[%s1900_s5 + $0x48] sm:$0xff] }
 0x119   : > { %v1697_v52 = vadd.f32 %v1474_v49, %v498_v51  ;;  %v1430_v49 = vld [vmem:[%s1900_s5 + $0x50] sm:$0xff]  ;;  %v1428_v51 = vld [vmem:[%s1900_s5 + $0x40] sm:$0xff] }
 0x11b   : > { %1389 = vmatmul.msk.f32.vlgmr.msra.gmra.mxu0 %vm508_vm5, %v1697_v52  ;;  %1390 = vmatmul.msk.f32.vlgmr.msra.gmra.mxu1 %vm508_vm5, %v1697_v52 }
 0x11c   : > { %1391 = vmatmul.msk.f32.vlgmr.msra.gmra.mxu2 %vm508_vm5, %v1697_v52  ;;  %834 = vmatpush.msra.mxu1 %v1415_v47 }
 0x11d   : > { %857 = vmatpush.msra.mxu2 %v661_v21 }
 0x123   : > { %1400 = vmatmul.msk.f32.vlgmr.msrb.gmra.mxu0 %vm508_vm5, %v1697_v52  ;;  %1405 = vmatmul.msk.f32.vlgmr.msrb.gmra.mxu1 %vm508_vm5, %v1697_v52 }
 0x124   : > { %1410 = vmatmul.msk.f32.vlgmr.msrb.gmra.mxu2 %vm508_vm5, %v1697_v52  ;;  %929 = vmatpush.msrb.mxu1 %v1431_v48 }
 0x126   : > { %930 = vmatpush.msrb.mxu1 %v1430_v49 }
 0x128   : > { %931 = vmatpush.msrb.mxu1 %v1429_v50 }
 0x12a   : > { %932 = vmatpush.msrb.mxu1 %v1428_v51 }
 0x198   : > { %v553_v53 = vpop.f32.mrf.mxu1  ;;  %v529_v54 = vpop.f32.mrf.mxu0 }
 0x199   : > { %1392 = vmatpush.xpose.msk.msra.mxu3 %vm580_vm6, %v553_v53  ;;  %v1442_v53 = vld [vmem:[%s1898_s3 + $0x78] sm:$0xff] }
 0x19c   : > { %1393 = vmatmul.msk.f32.vlgmr.msra.gmra.mxu3 %vm580_vm6, %v529_v54 }
 0x19f   : > { %v577_v55 = vpop.f32.mrf.mxu2 }
 0x1a0   : > { %1394 = vmatpush.msk.msrb.mxu3 %vm637_vm7, %v577_v55  ;;  %v709_v56 = vpop.f32.mrf.mxu1  ;;  %v684_v20 = vpop.f32.mrf.mxu0  ;;  %v1441_v55 = vld [vmem:[%s1898_s3 + $0x70] sm:$0xff] }
 0x1a2   : > { %1411 = vmatpush.xpose.msk.msra.mxu3 %vm580_vm6, %v709_v56  ;;  %v1440_v56 = vld [vmem:[%s1898_s3 + $0x68] sm:$0xff] }
 0x1a7   : > { %v734_v57 = vpop.f32.mrf.mxu2 }
 0x1a8   : > { %1413 = vmatpush.msk.msra.mxu0 %vm637_vm7, %v734_v57  ;;  %v1439_v57 = vld [vmem:[%s1898_s3 + $0x60] sm:$0xff] }
 0x1aa   : > { %904 = vmatpush.msrb.mxu0 %v1426_v31 }
 0x1ac   : > { %905 = vmatpush.msrb.mxu0 %v1425_v32 }
 0x1ae   : > { %906 = vmatpush.msrb.mxu0 %v1424_v33 }
 0x1b0   : > { %907 = vmatpush.msrb.mxu0 %v1423_v34 }
 0x21f   : > { %v604_v58 = vpop.f32.mrf.mxu3 }
 0x220   : > { %v607_v59 = vmul.f32 0.17677669, %v604_v58  ;;  %v1447_v58 = vld [vmem:[%s1899_s4 + $0x78] sm:$0xff] }
 0x222   : > { %v609_v60 = vsel %vm608_vm8, %v607_v59, -inf }
 0x223   : > { %610 = vmax.xlane.f32.xlu1 %v609_v60  ;;  %v1446_v60 = vld [vmem:[%s1899_s4 + $0x70] sm:$0xff] }
 0x296   : > { %v611_v61 = vpop.xlane.xlu1 %610 }
 0x297   : > { %v612_v62 = vsub.f32 %v607_v59, %v611_v61 }
 0x299   : > { %v613_v63 = vmul.f32 1.442695, %v612_v62  ;;  %v1445_v62 = vld [vmem:[%s1899_s4 + $0x68] sm:$0xff] }
 0x29b   : > { %1484 = vpow2.f32 %v613_v63  ;;  %v1444_v63 = vld [vmem:[%s1899_s4 + $0x60] sm:$0xff] }
 0x2a1   : > { %v1485_v1 = vpop.eup %1484 }
 0x2a2   : > { %v615_v2 = vsel %vm608_vm8, %v1485_v1, 0.0 }
 0x2a3   : > { %616 = vadd.xlane.f32.xlu1 %v615_v2 }
 0x316   : > { %v617_v3 = vpop.xlane.xlu1 %616 }
 0x317   : > { %1486 = vrcp.f32 %v617_v3  ;;  %v629_v7 = vand.u32 2147483648, %v617_v3  ;;  %v627_v10 = vand.u32 2147483647, %v617_v3  ;;  %vm623_vm10 = vweird.f32 %v617_v3 }
 0x319   : > { %v630_v12 = vor.u32 1.1754944e-38, %v629_v7  ;;  %vm628_vm12 = vcmp.eq.f32.partialorder %v627_v10, 8.507059e+37 }
 0x31d   : > { %v1487_v4 = vpop.eup %1486 }
 0x31e   : > { %v619_v5 = vmul.f32 %v1487_v4, %v617_v3  ;;  %vm624_vm9 = vweird.f32 %v1487_v4 }
 0x31f   : > { %vm625_vm11 = vmor %vm623_vm10, %vm624_vm9 }
 0x320   : > { %v620_v6 = vsub.f32 1.0, %v619_v5 }
 0x322   : > { %v621_v9 = vmul.f32 %v1487_v4, %v620_v6 }
 0x324   : > { %v622_v11 = vadd.f32 %v1487_v4, %v621_v9 }
 0x326   : > { %v626_v13 = vsel %vm625_vm11, %v1487_v4, %v622_v11 }
 0x327   : > { %v631_v14 = vsel %vm628_vm12, %v630_v12, %v626_v13 }
 0x328   : > { %v632_v15 = vmul.f32 %v1485_v1, %v631_v14  ;;  %v1437_v1 = vld [vmem:[%s1901_s6 + $0x10] sm:$0xff] }
 0x32a   : > { %1395 = vmatmul.msk.f32.vlgmr.msrb.gmra.mxu3 %vm633_vm13, %v632_v15 }
 0x32b   : > { %879 = vmatpush.msrb.mxu3 %v1421_v16  ;;  %v1452_v16 = vld [vmem:[%s1900_s5 + $0x78] sm:$0xff] }
 0x32d   : > { %880 = vmatpush.msrb.mxu3 %v1420_v17  ;;  %v1451_v17 = vld [vmem:[%s1900_s5 + $0x70] sm:$0xff] }
 0x32f   : > { %881 = vmatpush.msrb.mxu3 %v1419_v18  ;;  %v1450_v18 = vld [vmem:[%s1900_s5 + $0x68] sm:$0xff] }
 0x331   : > { %882 = vmatpush.msrb.mxu3 %v1418_v19  ;;  %v1449_v19 = vld [vmem:[%s1900_s5 + $0x60] sm:$0xff] }
 0x332   : > { %1412 = vmatmul.msk.f32.vlgmr.msra.gmra.mxu3 %vm580_vm6, %v684_v20 }
 0x33a   : > { %1422 = vmatmul.msk.f32.vlgmr.msrb.gmra.mxu3 %vm508_vm5, %v1697_v52 }
 0x3ad   : > { %v658_v22 = vpop.f32.mrf.mxu3 }
 0x3ae   : > { %1417 = vmatmul.msk.f32.vlgmr.msra.gmra.mxu2 %vm580_vm6, %v658_v22 }
 0x3b5   : > { %v760_v23 = vpop.f32.mrf.mxu3 }
 0x3b6   : > { %v763_v24 = vmul.f32 0.17677669, %v760_v23 }
 0x3b8   : > { %v764_v25 = vsel %vm608_vm8, %v763_v24, -inf }
 0x3b9   : > { %765 = vmax.xlane.f32.xlu2 %v764_v25 }
 0x3bd   : > { %v884_v61 = vpop.f32.mrf.mxu3 }
 0x42c   : > { %v766_v26 = vpop.xlane.xlu2 %765 }
 0x42d   : > { %v767_v27 = vsub.f32 %v763_v24, %v766_v26 }
 0x42f   : > { %v768_v28 = vmul.f32 1.442695, %v767_v27 }
 0x431   : > { %1488 = vpow2.f32 %v768_v28  ;;  %v859_v2 = vpop.f32.mrf.mxu2 }
 0x437   : > { %v1489_v29 = vpop.eup %1488 }
 0x438   : > { %v770_v30 = vsel %vm608_vm8, %v1489_v29, 0.0 }
 0x439   : > { %771 = vadd.xlane.f32.xlu2 %v770_v30 }
 0x4ac   : > { %v772_v35 = vpop.xlane.xlu2 %771 }
 0x4ad   : > { %1490 = vrcp.f32 %v772_v35  ;;  %v784_v39 = vand.u32 2147483648, %v772_v35  ;;  %v782_v41 = vand.u32 2147483647, %v772_v35  ;;  %vm778_vm15 = vweird.f32 %v772_v35 }
 0x4af   : > { %v785_v43 = vor.u32 1.1754944e-38, %v784_v39  ;;  %vm783_vm2 = vcmp.eq.f32.partialorder %v782_v41, 8.507059e+37 }
 0x4b3   : > { %v1491_v36 = vpop.eup %1490 }
 0x4b4   : > { %v774_v37 = vmul.f32 %v1491_v36, %v772_v35  ;;  %vm779_vm14 = vweird.f32 %v1491_v36 }
 0x4b5   : > { %vm780_vm1 = vmor %vm778_vm15, %vm779_vm14 }
 0x4b6   : > { %v775_v38 = vsub.f32 1.0, %v774_v37 }
 0x4b8   : > { %v776_v40 = vmul.f32 %v1491_v36, %v775_v38 }
 0x4ba   : > { %v777_v42 = vadd.f32 %v1491_v36, %v776_v40 }
 0x4bc   : > { %v781_v44 = vsel %vm780_vm1, %v1491_v36, %v777_v42 }
 0x4bd   : > { %v786_v45 = vsel %vm783_vm2, %v785_v43, %v781_v44  ;;  %v1458_v44 = vld [vmem:[%s1901_s6 + $0x18] sm:$0xff] }
 0x4be   : > { %v787_v46 = vmul.f32 %v1489_v29, %v786_v45 }
 0x4c0   : > { %1414 = vmatmul.msk.f32.vlgmr.msra.gmra.mxu0 %vm633_vm13, %v787_v46 }
 0x4c1   : > { %1034 = vmatpush.msra.mxu0 %v1437_v1 }
 0x4c8   : > { %1427 = vmatmul.msk.f32.vlgmr.msrb.gmra.mxu0 %vm508_vm5, %v1697_v52 }
 0x53d   : > { %v811_v54 = vpop.f32.mrf.mxu0 }
 0x53e   : > { %1416 = vmatmul.msk.f32.vlgmr.msra.gmra.mxu1 %vm580_vm6, %v811_v54 }
 0x53f   : > { %1057 = vmatpush.msra.mxu1 %v1442_v53 }
 0x541   : > { %1058 = vmatpush.msra.mxu1 %v1441_v55 }
 0x543   : > { %1059 = vmatpush.msra.mxu1 %v1440_v56 }
 0x545   : > { %v909_v59 = vpop.f32.mrf.mxu0  ;;  %1060 = vmatpush.msra.mxu1 %v1439_v57 }
 0x546   : > { %1432 = vmatmul.msk.f32.vlgmr.msrb.gmra.mxu1 %vm508_vm5, %v1697_v52  ;;  %1433 = vmatpush.xpose.msk.msrb.mxu2 %vm580_vm6, %v909_v59 }
 0x549   : > { %1434 = vmatmul.msk.f32.vlgmr.msrb.gmra.mxu2 %vm580_vm6, %v884_v61  ;;  %v1475_v61 = vld [vmem:[%s1902_s7] ss:$0 sm:$0xff] }
 0x54a   : > { %1082 = vmatpush.msra.mxu2 %v1447_v58 }
 0x54c   : > { %1083 = vmatpush.msra.mxu2 %v1446_v60 }
 0x54e   : > { %1084 = vmatpush.msra.mxu2 %v1445_v62  ;;  %1443 = vmatmul.msk.f32.vlgmr.msra.gmra.mxu1 %vm508_vm5, %v1697_v52 }
 0x550   : > { %1085 = vmatpush.msra.mxu2 %v1444_v63 }
 0x551   : > { %1448 = vmatmul.msk.f32.vlgmr.msra.gmra.mxu2 %vm508_vm5, %v1697_v52 }
 0x552   : > { %1212 = vmatpush.msrb.mxu2 %v1458_v44 }
 0x5bb   : > { %v836_v3 = vpop.f32.mrf.mxu1 }
 0x5bc   : > { %v860_v4 = vadd.f32 %v859_v2, %v836_v3 }
 0x5c3   : > { %v934_v5 = vpop.f32.mrf.mxu1 }
 0x5c4   : > { %1435 = vmatpush.msk.msra.mxu3 %vm637_vm7, %v934_v5 }
 0x5c6   : > { %1107 = vmatpush.msrb.mxu3 %v1452_v16 }
 0x5c8   : > { %1108 = vmatpush.msrb.mxu3 %v1451_v17 }
 0x5ca   : > { %1109 = vmatpush.msrb.mxu3 %v1450_v18 }
 0x5cb   : > { %v1062_v33 = vpop.f32.mrf.mxu1 }
 0x5cc   : > { %v960_v6 = vpop.f32.mrf.mxu2  ;;  %1110 = vmatpush.msrb.mxu3 %v1449_v19 }
 0x5cd   : > { %v963_v7 = vmul.f32 0.17677669, %v960_v6 }
 0x5cf   : > { %v964_v9 = vsel %vm608_vm8, %v963_v7, -inf }
 0x5d0   : > { %965 = vmax.xlane.f32.xlu0 %v964_v9  ;;  %v1257_v9 = vld [vmem:[%s1905_s10 + $0x8] sm:$0xff] }
 0x5d4   : > { %v1087_v10 = vpop.f32.mrf.mxu2 }
 0x5d5   : > { %1454 = vmatpush.xpose.msk.msrb.mxu0 %vm580_vm6, %v1087_v10  ;;  %v1256_v10 = vld [vmem:[%s1905_s10] sm:$0xff] }
 0x643   : > { %v966_v11 = vpop.xlane.xlu0 %965 }
 0x644   : > { %v967_v12 = vsub.f32 %v963_v7, %v966_v11  ;;  %v1259_v7 = vld [vmem:[%s1905_s10 + $0x18] sm:$0xff] }
 0x646   : > { %v968_v13 = vmul.f32 1.442695, %v967_v12 }
 0x648   : > { %1492 = vpow2.f32 %v968_v13 }
 0x64e   : > { %v1493_v14 = vpop.eup %1492 }
 0x64f   : > { %v970_v15 = vsel %vm608_vm8, %v1493_v14, 0.0 }
 0x650   : > { %971 = vadd.xlane.f32.xlu1 %v970_v15 }
 0x6c3   : > { %v972_v20 = vpop.xlane.xlu1 %971 }
 0x6c4   : > { %1494 = vrcp.f32 %v972_v20  ;;  %v984_v24 = vand.u32 2147483648, %v972_v20  ;;  %v982_v26 = vand.u32 2147483647, %v972_v20  ;;  %vm978_vm4 = vweird.f32 %v972_v20 }
 0x6c6   : > { %v985_v28 = vor.u32 1.1754944e-38, %v984_v24  ;;  %vm983_vm10 = vcmp.eq.f32.partialorder %v982_v26, 8.507059e+37  ;;  %v1298_v26 = vld [vmem:[%s1907_s12 + $0x10] sm:$0xff] }
 0x6ca   : > { %v1495_v21 = vpop.eup %1494 }
 0x6cb   : > { %v974_v22 = vmul.f32 %v1495_v21, %v972_v20  ;;  %vm979_vm3 = vweird.f32 %v1495_v21  ;;  %v1476_v20 = vld [vmem:[%s1903_s8] ss:$0 sm:$0xff] }
 0x6cc   : > { %vm980_vm9 = vmor %vm978_vm4, %vm979_vm3 }
 0x6cd   : > { %v975_v23 = vsub.f32 1.0, %v974_v22 }
 0x6cf   : > { %v976_v25 = vmul.f32 %v1495_v21, %v975_v23 }
 0x6d1   : > { %v977_v27 = vadd.f32 %v1495_v21, %v976_v25  ;;  %v1299_v25 = vld [vmem:[%s1907_s12 + $0x18] sm:$0xff] }
 0x6d3   : > { %v981_v29 = vsel %vm980_vm9, %v1495_v21, %v977_v27  ;;  %v1297_v27 = vld [vmem:[%s1907_s12 + $0x8] sm:$0xff] }
 0x6d4   : > { %v986_v30 = vsel %vm983_vm10, %v985_v28, %v981_v29  ;;  %v1296_v28 = vld [vmem:[%s1907_s12] sm:$0xff] }
 0x6d5   : > { %v987_v31 = vmul.f32 %v1493_v14, %v986_v30  ;;  %v1478_v29 = vld [vmem:[%s1906_s11] ss:$0 sm:$0xff] }
 0x6d7   : > { %1436 = vmatmul.msk.f32.vlgmr.msra.gmra.mxu3 %vm633_vm13, %v987_v31 }
 0x6d8   : > { %1279 = vmatpush.msra.mxu3 %v1259_v7 }
 0x6df   : > { %1453 = vmatmul.msk.f32.vlgmr.msrb.gmra.mxu3 %vm508_vm5, %v1697_v52 }
 0x75a   : > { %v1011_v32 = vpop.f32.mrf.mxu3 }
 0x75b   : > { %1438 = vmatmul.msk.f32.vlgmr.msra.gmra.mxu0 %vm580_vm6, %v1011_v32 }
 0x75c   : > { %1319 = vmatpush.msra.mxu0 %v1299_v25 }
 0x75e   : > { %1320 = vmatpush.msra.mxu0 %v1298_v26 }
 0x760   : > { %1321 = vmatpush.msra.mxu0 %v1297_v27 }
 0x762   : > { %v1112_v34 = vpop.f32.mrf.mxu3  ;;  %1322 = vmatpush.msra.mxu0 %v1296_v28 }
 0x763   : > { %1455 = vmatmul.msk.f32.vlgmr.msrb.gmra.mxu0 %vm580_vm6, %v1062_v33  ;;  %1456 = vmatpush.msk.msrb.mxu1 %vm637_vm7, %v1112_v34 }
 0x7d8   : > { %v1036_v35 = vpop.f32.mrf.mxu0 }
 0x7d9   : > { %v1039_v36 = vadd.f32 %v1036_v35, %v860_v4 }
 0x7e0   : > { %v1138_v37 = vpop.f32.mrf.mxu0 }
 0x7e1   : > { %v1141_v38 = vmul.f32 0.17677669, %v1138_v37 }
 0x7e3   : > { %v1142_v39 = vsel %vm608_vm8, %v1141_v38, -inf }
 0x7e4   : > { %1143 = vmax.xlane.f32.xlu2 %v1142_v39 }
 0x857   : > { %v1144_v40 = vpop.xlane.xlu2 %1143 }
 0x858   : > { %v1145_v41 = vsub.f32 %v1141_v38, %v1144_v40 }
 0x85a   : > { %v1146_v42 = vmul.f32 1.442695, %v1145_v41  ;;  %v1479_v41 = vld [vmem:[%s1908_s13] ss:$0 sm:$0xff] }
 0x85c   : > { %1496 = vpow2.f32 %v1146_v42 }
 0x862   : > { %v1497_v52 = vpop.eup %1496 }
 0x863   : > { %v1148_v43 = vsel %vm608_vm8, %v1497_v52, 0.0 }
 0x864   : > { %1149 = vadd.xlane.f32.xlu0 %v1148_v43 }
 0x8d7   : > { %v1150_v45 = vpop.xlane.xlu0 %1149 }
 0x8d8   : > { %1498 = vrcp.f32 %v1150_v45  ;;  %v1162_v49 = vand.u32 2147483648, %v1150_v45  ;;  %v1160_v51 = vand.u32 2147483647, %v1150_v45  ;;  %vm1156_vm11 = vweird.f32 %v1150_v45 }
 0x8da   : > { %v1163_v54 = vor.u32 1.1754944e-38, %v1162_v49  ;;  %vm1161_vm8 = vcmp.eq.f32.partialorder %v1160_v51, 8.507059e+37 }
 0x8de   : > { %v1499_v46 = vpop.eup %1498 }
 0x8df   : > { %v1152_v47 = vmul.f32 %v1499_v46, %v1150_v45  ;;  %vm1157_vm7 = vweird.f32 %v1499_v46 }
 0x8e0   : > { %vm1158_vm12 = vmor %vm1156_vm11, %vm1157_vm7 }
 0x8e1   : > { %v1153_v48 = vsub.f32 1.0, %v1152_v47 }
 0x8e3   : > { %v1154_v50 = vmul.f32 %v1499_v46, %v1153_v48 }
 0x8e5   : > { %v1155_v53 = vadd.f32 %v1499_v46, %v1154_v50 }
 0x8e7   : > { %v1159_v55 = vsel %vm1158_vm12, %v1499_v46, %v1155_v53 }
 0x8e8   : > { %v1164_v56 = vsel %vm1161_vm8, %v1163_v54, %v1159_v55 }
 0x8e9   : > { %v1165_v57 = vmul.f32 %v1497_v52, %v1164_v56 }
 0x8eb   : > { %1457 = vmatmul.msk.f32.vlgmr.msrb.gmra.mxu1 %vm633_vm13, %v1165_v57 }
 0x968   : > { %v1189_v58 = vpop.f32.mrf.mxu1 }
 0x969   : > { %1459 = vmatmul.msk.f32.vlgmr.msrb.gmra.mxu2 %vm580_vm6, %v1189_v58 }
 0x9ec   : > { %v1214_v59 = vpop.f32.mrf.mxu2 }
 0x9ed   : > { %v1217_v60 = vadd.f32 %v1214_v59, %v1039_v36 }
 0x9ef   : > { %v1218_v62 = vadd.f32 %v1217_v60, %v1604_v0  ;;  %v1258_v0 = vld [vmem:[%s1905_s10 + $0x10] sm:$0xff] }
 0x9f0   : > { %1280 = vmatpush.msra.mxu3 %v1258_v0 }
 0x9f1   : > { %v1839_v63 = vadd.f32 %v1475_v61, %v1218_v62 }
 0x9f2   : > { %1281 = vmatpush.msra.mxu3 %v1257_v9 }
 0x9f3   : > { %v1224_v1 = vsel %vm464_vm0, %v1839_v63, 0.0 }
 0x9f4   : > { %1225 = vadd.xlane.f32.xlu1 %v1224_v1  ;;  %1282 = vmatpush.msra.mxu3 %v1256_v10 }
 0xa67   : > { %v1226_v2 = vpop.xlane.xlu1 %1225 }
 0xa68   : > { %v1227_v3 = vmul.f32 %v1226_v2, %v1608_v8 }
 0xa6a   : > { %v1228_v4 = vsub.f32 %v1839_v63, %v1227_v3 }
 0xa6c   : > { %v1229_v5 = vmul.f32 %v1228_v4, %v1228_v4 }
 0xa6e   : > { %v1230_v6 = vsel %vm464_vm0, %v1229_v5, 0.0 }
 0xa6f   : > { %1231 = vadd.xlane.f32.xlu2 %v1230_v6 }
 0xae2   : > { %v1232_v11 = vpop.xlane.xlu2 %1231 }
 0xae3   : > { %v1233_v12 = vmul.f32 %v1232_v11, %v1608_v8  ;;  %v1477_v8 = vld [vmem:[%s1904_s9] ss:$0 sm:$0xff] }
 0xae5   : > { %v1234_v13 = vadd.f32 1e-05, %v1233_v12 }
 0xae7   : > { %1500 = vrsqrt.f32 %v1234_v13  ;;  %vm1241_vm13 = vweird.f32 %v1234_v13 }
 0xaed   : > { %v1501_v14 = vpop.eup %1500 }
 0xaee   : > { %v1236_v15 = vmul.f32 %v1501_v14, %v1234_v13  ;;  %vm1242_vm6 = vweird.f32 %v1501_v14 }
 0xaef   : > { %vm1243_vm14 = vmor %vm1241_vm13, %vm1242_vm6 }
 0xaf0   : > { %v1237_v16 = vmul.f32 %v1501_v14, %v1236_v15 }
 0xaf2   : > { %v1238_v17 = vmul.f32 0.5, %v1237_v16 }
 0xaf4   : > { %v1239_v18 = vsub.f32 1.5, %v1238_v17 }
 0xaf6   : > { %v1240_v19 = vmul.f32 %v1501_v14, %v1239_v18 }
 0xaf8   : > { %v1244_v21 = vsel %vm1243_vm14, %v1501_v14, %v1240_v19 }
 0xaf9   : > { %v1245_v22 = vmul.f32 %v1244_v21, %v1228_v4 }
 0xafb   : > { %v1250_v23 = vmul.f32 %v1476_v20, %v1245_v22 }
 0xafd   : > { %v1255_v24 = vadd.f32 %v1477_v8, %v1250_v23 }
 0xaff   : > { %1460 = vmatmul.msk.f32.vlgmr.msra.gmra.mxu3 %vm508_vm5, %v1255_v24 }
 0xb82   : > { %v1284_v30 = vpop.f32.mrf.mxu3 }
 0xb83   : > { %v1285_v31 = vadd.f32 %v1478_v29, %v1284_v30 }
 0xb85   : > { %v1287_v32 = vmul.f32 %v1285_v31, %v1285_v31 }
 0xb87   : > { %v1288_v33 = vmul.f32 %v1287_v32, %v1285_v31 }
 0xb89   : > { %v1289_v34 = vmul.f32 0.044715, %v1288_v33 }
 0xb8b   : > { %v1290_v35 = vadd.f32 %v1289_v34, %v1285_v31 }
 0xb8d   : > { %v1291_v36 = vmul.f32 0.7978846, %v1290_v35 }
 0xb8f   : > { %1502 = vtanh.f32 %v1291_v36 }
 0xb95   : > { %v1503_v37 = vpop.eup %1502 }
 0xb96   : > { %v1293_v38 = vadd.f32 1.0, %v1503_v37 }
 0xb98   : > { %v1294_v39 = vmul.f32 0.5, %v1293_v38 }
 0xb9a   : > { %v1295_v40 = vmul.f32 %v1294_v39, %v1285_v31 }
 0xb9c   : > { %1461 = vmatmul.msk.f32.vlgmr.msra.gmra.mxu0 %vm508_vm5, %v1295_v40 }
 0xc19   : > { %v1324_v42 = vpop.f32.mrf.mxu0 }
 0xc1a   : > { %v1325_v52 = vadd.f32 %v1479_v41, %v1324_v42 }
 0xc1c   : > { %v1327_v43 = vadd.f32 %v1325_v52, %v1839_v63 }
 0xc1e   : > { %1328 = vst.msk [vmem:[%s462_s25] sm:$0x1f] %vm464_vm0, %v1327_v43 }
 0xc1f PF: > { %s24_s29 = sadd.s32 1, %s1510_s29  }
 0xc20   : > { %p21_p4 = scmp.ge.s32.totalorder %s24_s29, 4  }
 0xc22   :  { %23 = sbr.rel (!%p21_p4) target bundleno = 1 (0x1), region = 118 }

</bundles_post_ra>
